<compile_context>
chip_gen: v7x
topology: tpu7x:2x2x1
jax: 0.10.0
libtpu: 0.0.40
codegen_flags: <defaults>
</compile_context>

<pallas_src>
import jax
import jax.numpy as jnp
from jax.experimental import pallas as pl
from jax.experimental.pallas import tpu as pltpu


# ----------------------------------------------------------------------------
# Fused bidirectional GRU layer kernel.
# Grid = (ndir, n_time_chunks); direction axis is "parallel", time axis is
# "arbitrary" (sequential recurrence). Hidden state lives in VMEM scratch.
# Gate order matches PyTorch: [r (reset), z (update), n (new)].
# The layer input arrives as feature groups (G, T, B, Dg): G=1 for layer 0,
# G=ndir for deeper layers (previous layer's per-direction outputs), so no
# concatenated activation is ever materialized in HBM.
# ----------------------------------------------------------------------------
def make_gru_kernel(t_chunk, seq_len, t_total, hidden, ngroups, unroll):
    H = hidden

    def kernel(x_ref, wih_ref, whh_ref, brz_ref, bin_ref, bhn_ref,
               o_ref, h_ref, gi_ref):
        # x_ref:   (G, Tc, B, Dg)    time chunk of the grouped layer input
        # wih_ref: (ndir, G, Dg, 3H) fused input->hidden weights [r | z | n]
        # whh_ref: (ndir, H, 3H)     fused hidden->hidden weights [r | z | n]
        # brz_ref: (ndir, 1, 2H)     fused r,z bias: bih_rz + bhh_rz
        # bin_ref: (ndir, 1, H)      bih_n
        # bhn_ref: (ndir, 1, H)      bhh_n (stays inside the r*(...) term)
        # o_ref:   (Tc, B, H)        this direction's output slab for the chunk
        # h_ref:   (B, H)  f32       running hidden state (persists across grid)
        # gi_ref:  (Tc*B, 3H) f32    per-chunk precomputed input projection
        d = pl.program_id(0)              # 0 = forward, 1 = backward
        c = pl.program_id(1)              # time-chunk index (sequential)
        nchunks = pl.num_programs(1)
        B = h_ref.shape[0]

        @pl.when(c == 0)
        def _():
            h_ref[...] = jnp.zeros_like(h_ref)

        # --- hoisted input projection: one (Tc*B, Dg) @ (Dg, 3H) per group ---
        wih = wih_ref[d]                                   # (G, Dg, 3H)
        gi = jnp.dot(x_ref[0].reshape(t_chunk * B, -1), wih[0],
                     preferred_element_type=jnp.float32)
        for g in range(1, ngroups):
            gi = gi + jnp.dot(x_ref[g].reshape(t_chunk * B, -1), wih[g],
                              preferred_element_type=jnp.float32)
        gi_ref[...] = gi                                   # (Tc*B, 3H)

        whh = whh_ref[d]                                   # (H, 3H)
        b_rz = brz_ref[d]                                  # (1, 2H)
        b_in = bin_ref[d]                                  # (1, H)
        b_hn = bhn_ref[d]                                  # (1, H)

        if t_total > seq_len:
            blk = (1 - d) * c + d * (nchunks - 1 - c)      # global time block
            t0 = blk * t_chunk

        def step(i, h):
            # forward walks i; backward walks t_chunk-1-i (within-chunk
            # reversal; chunk-level reversal is done by the index_map).
            t = (1 - d) * i + d * (t_chunk - 1 - i)
            row = pl.multiple_of(t * B, B)
            g_t = gi_ref[pl.ds(row, B), :]                 # (B, 3H) precomputed
            gh = jnp.dot(h, whh, preferred_element_type=jnp.float32)  # (B, 3H)
            rz = jax.nn.sigmoid(g_t[:, :2 * H] + gh[:, :2 * H] + b_rz)
            r = rz[:, :H]
            z = rz[:, H:]
            n = jnp.tanh(g_t[:, 2 * H:] + b_in + r * (gh[:, 2 * H:] + b_hn))
            h_new = (1.0 - z) * n + z * h
            if t_total > seq_len:
                # zero-padded tail timesteps must not advance the recurrence
                h_new = jnp.where(t0 + t < seq_len, h_new, h)
            o_ref[t] = h_new.astype(o_ref.dtype)
            return h_new

        h_ref[...] = jax.lax.fori_loop(0, t_chunk, step, h_ref[...],
                                       unroll=unroll)

    return kernel


def run_gru_layer_bidir(x_groups, wih, whh, b_rz, b_in, b_hn, *,
                        t_chunk, seq_len):
    """Both directions of one GRU layer in a single pallas_call.

    x_groups: (G, T_pad, B_pad, Dg) time-major grouped input.
    Returns (ndir, T_pad, B_pad, H) f32 (per-direction outputs, no concat).
    """
    G, T_pad, B_pad, Dg = x_groups.shape
    ndir = wih.shape[0]
    H = whh.shape[1]
    assert T_pad % t_chunk == 0
    nchunks = T_pad // t_chunk

    def time_block(d, c):
        # forward: chunks 0..nchunks-1; backward: reversed.
        return (1 - d) * c + d * (nchunks - 1 - c)

    kernel = make_gru_kernel(t_chunk=t_chunk, seq_len=seq_len, t_total=T_pad,
                             hidden=H, ngroups=G, unroll=min(t_chunk, 8))

    return pl.pallas_call(
        kernel,
        out_shape=jax.ShapeDtypeStruct((ndir, T_pad, B_pad, H), jnp.float32),
        grid_spec=pltpu.PrefetchScalarGridSpec(
            num_scalar_prefetch=0,
            grid=(ndir, nchunks),
            in_specs=[
                # time chunk of the grouped layer input (double-buffered)
                pl.BlockSpec((G, t_chunk, B_pad, Dg),
                             lambda d, c: (0, time_block(d, c), 0, 0)),
                # grid-invariant weights / biases: whole (both-direction)
                # blocks, single-buffered so they are not duplicated in VMEM
                pl.BlockSpec((ndir, G, Dg, 3 * H), lambda d, c: (0, 0, 0, 0),
                             pipeline_mode=pl.Buffered(1)),
                pl.BlockSpec((ndir, H, 3 * H), lambda d, c: (0, 0, 0),
                             pipeline_mode=pl.Buffered(1)),
                pl.BlockSpec((ndir, 1, 2 * H), lambda d, c: (0, 0, 0),
                             pipeline_mode=pl.Buffered(1)),
                pl.BlockSpec((ndir, 1, H), lambda d, c: (0, 0, 0),
                             pipeline_mode=pl.Buffered(1)),
                pl.BlockSpec((ndir, 1, H), lambda d, c: (0, 0, 0),
                             pipeline_mode=pl.Buffered(1)),
            ],
            out_specs=pl.BlockSpec((None, t_chunk, B_pad, H),
                                   lambda d, c: (d, time_block(d, c), 0, 0)),
            scratch_shapes=[
                pltpu.VMEM((B_pad, H), jnp.float32),              # hidden state
                pltpu.VMEM((t_chunk * B_pad, 3 * H), jnp.float32)  # input proj
            ],
        ),
        compiler_params=pltpu.CompilerParams(
            # direction axis independent -> parallel (megacore on v7x);
            # time axis carries the recurrence -> arbitrary (and last in grid).
            dimension_semantics=("parallel", "arbitrary"),
            vmem_limit_bytes=48 * 1024 * 1024,
        ),
    )(x_groups, wih, whh, b_rz, b_in, b_hn)


# ----------------------------------------------------------------------------
# Attention + linear head kernel, time-major, consuming the per-direction
# grouped GRU output directly (no concat / transpose in the wrapper):
#   M = tanh(op); scores = (M @ w) * pad; alpha = softmax(scores over T)
#   out = (sum_t op * alpha) @ W_lin + b_lin
# Softmax is over T, so tiling over batch is exact.
# ----------------------------------------------------------------------------
def make_attention_kernel(seq_len, t_total, ndir):
    def kernel(op_ref, pad_ref, w_ref, linw_ref, linb_ref, out_ref):
        # op_ref : (ndir, T_pad, tb, H)  time-major per-direction GRU outputs
        # pad_ref: (T_pad, tb)           multiplicative pad mask (module semantics)
        # w_ref  : (ndir, 1, H)          attention vector, split per direction
        # linw   : (ndir, H, out_pad)    linear weights, split per direction
        # linb   : (1, out_pad)
        scores = None
        for g in range(ndir):
            s_g = jnp.sum(jnp.tanh(op_ref[g]) * w_ref[g], axis=-1)  # (T_pad, tb)
            scores = s_g if scores is None else scores + s_g
        scores = scores * pad_ref[...]          # multiplicative mask (as in PyTorch)
        if t_total > seq_len:
            # exclude zero-padded tail timesteps from the softmax entirely
            t_idx = jax.lax.broadcasted_iota(jnp.int32, scores.shape, 0)
            scores = jnp.where(t_idx < seq_len, scores, -1e30)
        smax = jnp.max(scores, axis=0, keepdims=True)
        e = jnp.exp(scores - smax)
        alpha = e / jnp.sum(e, axis=0, keepdims=True)       # softmax over time

        acc = None
        for g in range(ndir):
            # weighted sum over T on the VPU (overlaps under the EUP tanh above)
            wfeat = jnp.sum(op_ref[g] * alpha[:, :, None], axis=0)   # (tb, H)
            contrib = jnp.dot(wfeat, linw_ref[g],
                              preferred_element_type=jnp.float32)
            acc = contrib if acc is None else acc + contrib
        out_ref[...] = (acc + linb_ref[...]).astype(out_ref.dtype)

    return kernel


def run_attention_head(op_split, pad_tb, w_split, lin_w_split, lin_b_pad, *,
                       seq_len, tb=None):
    ndir, T_pad, B_pad, H = op_split.shape
    out_pad = lin_w_split.shape[-1]            # multiple of 128 -> lane-dense stores
    if tb is None:
        # full-batch block; for production-size (B,T,DH) pick tb so
        # tb*T*DH*4*2 stays within ~16-24 MiB on v7x (keep tb a mult of 128
        # or keep the default so the pad-mask block stays lane-full).
        tb = B_pad
    assert B_pad % tb == 0

    kernel = make_attention_kernel(seq_len=seq_len, t_total=T_pad, ndir=ndir)
    return pl.pallas_call(
        kernel,
        out_shape=jax.ShapeDtypeStruct((B_pad, out_pad), jnp.float32),
        grid_spec=pltpu.PrefetchScalarGridSpec(
            num_scalar_prefetch=0,
            grid=(B_pad // tb,),
            in_specs=[
                pl.BlockSpec((ndir, T_pad, tb, H), lambda i: (0, 0, i, 0)),
                pl.BlockSpec((T_pad, tb), lambda i: (0, i)),
                pl.BlockSpec((ndir, 1, H), lambda i: (0, 0, 0),
                             pipeline_mode=pl.Buffered(1)),
                pl.BlockSpec((ndir, H, out_pad), lambda i: (0, 0, 0),
                             pipeline_mode=pl.Buffered(1)),
                pl.BlockSpec((1, out_pad), lambda i: (0, 0),
                             pipeline_mode=pl.Buffered(1)),
            ],
            out_specs=pl.BlockSpec((tb, out_pad), lambda i: (i, 0)),
        ),
        compiler_params=pltpu.CompilerParams(
            dimension_semantics=("parallel",),
            vmem_limit_bytes=48 * 1024 * 1024,
        ),
    )(op_split, pad_tb, w_split, lin_w_split, lin_b_pad)


# ----------------------------------------------------------------------------
# Parameter construction (deterministic, PyTorch-style uniform init).
# Builds the per-gate layout (pure-JAX reference) and the fused / group-split
# kernel layout.
# ----------------------------------------------------------------------------
def make_params(key, input_dim, hidden_dim, output_dim, num_layers,
                bidirectional=True):
    num_dirs = 2 if bidirectional else 1
    H = hidden_dim
    DH = H * num_dirs
    k_gru = 1.0 / jnp.sqrt(H)
    keys = jax.random.split(key, num_layers * num_dirs * 4 + 3)
    idx = 0
    gru = []        # reference (per-gate) layout
    gru_fused = []  # kernel (fused, group-split) layout
    for layer in range(num_layers):
        d_in = input_dim if layer == 0 else DH
        ngroups = 1 if layer == 0 else num_dirs
        dg = d_in // ngroups
        dirs = []
        for _ in range(num_dirs):
            wih = jax.random.uniform(keys[idx], (3, d_in, H), jnp.float32, -k_gru, k_gru); idx += 1
            whh = jax.random.uniform(keys[idx], (3, H, H), jnp.float32, -k_gru, k_gru); idx += 1
            bih = jax.random.uniform(keys[idx], (3, 1, H), jnp.float32, -k_gru, k_gru); idx += 1
            bhh = jax.random.uniform(keys[idx], (3, 1, H), jnp.float32, -k_gru, k_gru); idx += 1
            dirs.append((wih, whh, bih, bhh))
        gru.append(dirs)
        wih_fused = jnp.stack([jnp.concatenate([w[0], w[1], w[2]], axis=-1)
                               for (w, _, _, _) in dirs])          # (ndir, d_in, 3H)
        gru_fused.append({
            "wih": wih_fused.reshape(num_dirs, ngroups, dg, 3 * H),  # group-split rows
            "whh": jnp.stack([jnp.concatenate([w[0], w[1], w[2]], axis=-1)
                              for (_, w, _, _) in dirs]),            # (ndir, H, 3H)
            "b_rz": jnp.stack([jnp.concatenate([bi[0] + bh[0], bi[1] + bh[1]], axis=-1)
                               for (_, _, bi, bh) in dirs]),          # (ndir, 1, 2H)
            "b_in": jnp.stack([bi[2] for (_, _, bi, _) in dirs]),     # (ndir, 1, H)
            "b_hn": jnp.stack([bh[2] for (_, _, _, bh) in dirs]),     # (ndir, 1, H)
        })
    # attention vector w: module inits it to zeros; use small random values here
    # so the synthetic forward pass is non-degenerate (semantics unchanged).
    w_row = 0.1 * jax.random.normal(keys[idx], (1, DH), jnp.float32); idx += 1
    k_lin = 1.0 / jnp.sqrt(DH)
    lin_w = jax.random.uniform(keys[idx], (DH, output_dim), jnp.float32, -k_lin, k_lin); idx += 1
    lin_b = jax.random.uniform(keys[idx], (1, output_dim), jnp.float32, -k_lin, k_lin); idx += 1
    # lane-pad the linear head to a multiple of 128 for lane-dense kernel stores
    out_pad = ((output_dim + 127) // 128) * 128
    lin_w_pad = jnp.zeros((DH, out_pad), jnp.float32).at[:, :output_dim].set(lin_w)
    lin_b_pad = jnp.zeros((1, out_pad), jnp.float32).at[:, :output_dim].set(lin_b)
    # per-direction splits for the head kernel (op stays grouped by direction)
    w_split = w_row.reshape(1, num_dirs, H).transpose(1, 0, 2)       # (ndir, 1, H)
    lin_w_split = lin_w_pad.reshape(num_dirs, H, out_pad)            # (ndir, H, out_pad)
    return {"gru": gru, "gru_fused": gru_fused,
            "w": w_row, "w_split": w_split,
            "lin_w": lin_w, "lin_b": lin_b,
            "lin_w_split": lin_w_split, "lin_b_pad": lin_b_pad,
            "out_dim": output_dim}


# ----------------------------------------------------------------------------
# Full forward pass (Pallas kernels for the hot path, cheap glue in plain JAX).
# ----------------------------------------------------------------------------
def gru_attention_forward(x_btd, pad_bt, params, t_chunk=None, tb=None):
    B, T, _ = x_btd.shape
    B_pad = ((B + 7) // 8) * 8                 # dense sublanes
    if t_chunk is None:
        t_chunk = min(T, 32)
    T_pad = -(-T // t_chunk) * t_chunk         # zero-pad tail, don't shrink chunk

    x = jnp.transpose(x_btd, (1, 0, 2))                         # (T, B, D) time-major
    x = jnp.pad(x, ((0, T_pad - T), (0, B_pad - B), (0, 0)))
    h = x[None]                                                 # (1, T_pad, B_pad, D)
    for layer in params["gru_fused"]:
        h = run_gru_layer_bidir(h, layer["wih"], layer["whh"],
                                layer["b_rz"], layer["b_in"], layer["b_hn"],
                                t_chunk=t_chunk, seq_len=T)     # (ndir, T_pad, B_pad, H)

    pad_tb = jnp.pad(jnp.transpose(pad_bt, (1, 0)),
                     ((0, T_pad - T), (0, B_pad - B)))          # (T_pad, B_pad)
    full = run_attention_head(h, pad_tb, params["w_split"],
                              params["lin_w_split"], params["lin_b_pad"],
                              seq_len=T, tb=tb)                 # (B_pad, out_pad)
    return full[:B, :params["out_dim"]]


# ----------------------------------------------------------------------------
# Pure-JAX reference (mirrors PyTorch forward exactly) for verification.
# ----------------------------------------------------------------------------
def _gru_layer_ref(x_tbd, wih, whh, bih, bhh):
    H = whh.shape[-1]
    B = x_tbd.shape[1]

    def step(hprev, x_t):
        gi_r = x_t @ wih[0] + bih[0]
        gi_z = x_t @ wih[1] + bih[1]
        gi_n = x_t @ wih[2] + bih[2]
        gh_r = hprev @ whh[0] + bhh[0]
        gh_z = hprev @ whh[1] + bhh[1]
        gh_n = hprev @ whh[2] + bhh[2]
        r = jax.nn.sigmoid(gi_r + gh_r)
        z = jax.nn.sigmoid(gi_z + gh_z)
        n = jnp.tanh(gi_n + r * gh_n)
        hnew = (1.0 - z) * n + z * hprev
        return hnew, hnew

    h0 = jnp.zeros((B, H), jnp.float32)
    _, ys = jax.lax.scan(step, h0, x_tbd)
    return ys


def gru_attention_forward_ref(x_btd, pad_bt, params):
    h = jnp.transpose(x_btd, (1, 0, 2))
    for layer_dirs in params["gru"]:
        outs = []
        for direction, (wih, whh, bih, bhh) in enumerate(layer_dirs):
            xin = h if direction == 0 else h[::-1]
            out = _gru_layer_ref(xin, wih, whh, bih, bhh)
            if direction == 1:
                out = out[::-1]
            outs.append(out)
        h = jnp.concatenate(outs, axis=-1)
    op = jnp.transpose(h, (1, 0, 2))                      # (B, T, DH)
    m = jnp.tanh(op)
    scores = jnp.einsum("btd,d->bt", m, params["w"][0])   # matmul(M, w).squeeze(2)
    scores = scores * pad_bt
    alpha = jax.nn.softmax(scores, axis=1)
    weighted = jnp.sum(op * alpha[:, :, None], axis=1)
    return weighted @ params["lin_w"] + params["lin_b"]


if __name__ == "__main__":
    B, T, input_dim, hidden_dim, output_dim, num_layers = 2, 8, 16, 32, 4, 2

    key = jax.random.PRNGKey(0)
    kx, kpad, kp = jax.random.split(key, 3)
    x = jax.random.normal(kx, (B, T, input_dim), jnp.float32)
    pad_list = (jax.random.uniform(kpad, (B, T)) > 0.2).astype(jnp.float32)
    params = make_params(kp, input_dim, hidden_dim, output_dim, num_layers,
                         bidirectional=True)

    out = jax.block_until_ready(gru_attention_forward(x, pad_list, params))
    ref = jax.block_until_ready(gru_attention_forward_ref(x, pad_list, params))

    assert out.shape == (B, output_dim), out.shape
    assert jnp.allclose(out, ref, atol=2e-3, rtol=2e-3), (out, ref)
    print("KERNEL_OK")
</pallas_src>

<mosaic_0001>
module attributes {stable_mosaic.version = 11 : i64} {
  func.func @kernel(%arg0: i32, %arg1: i32, %arg2: memref<1x8x8x16xf32, #tpu.memory_space<vmem>>, %arg3: memref<2x1x16x96xf32, #tpu.memory_space<vmem>>, %arg4: memref<2x32x96xf32, #tpu.memory_space<vmem>>, %arg5: memref<2x1x64xf32, #tpu.memory_space<vmem>>, %arg6: memref<2x1x32xf32, #tpu.memory_space<vmem>>, %arg7: memref<2x1x32xf32, #tpu.memory_space<vmem>>, %arg8: memref<1x8x8x32xf32, #tpu.memory_space<vmem>>, %arg9: memref<8x32xf32, #tpu.memory_space<vmem>>, %arg10: memref<64x96xf32, #tpu.memory_space<vmem>>) attributes {dimension_semantics = [#tpu.dimension_semantics<parallel>, #tpu.dimension_semantics<arbitrary>], iteration_bounds = array<i64: 2, 1>, scalar_prefetch = 0 : i64, scratch_operands = 2 : i64, tpu.core_type = #tpu.core_type<tc>, window_params = [{transform_indices = @transform_0, window_bounds = array<i64: 1, 8, 8, 16>}, {pipeline_mode = #tpu.pipeline_mode<synchronous>, transform_indices = @transform_1, window_bounds = array<i64: 2, 1, 16, 96>}, {pipeline_mode = #tpu.pipeline_mode<synchronous>, transform_indices = @transform_2, window_bounds = array<i64: 2, 32, 96>}, {pipeline_mode = #tpu.pipeline_mode<synchronous>, transform_indices = @transform_3, window_bounds = array<i64: 2, 1, 64>}, {pipeline_mode = #tpu.pipeline_mode<synchronous>, transform_indices = @transform_4, window_bounds = array<i64: 2, 1, 32>}, {pipeline_mode = #tpu.pipeline_mode<synchronous>, transform_indices = @transform_5, window_bounds = array<i64: 2, 1, 32>}, {transform_indices = @transform_6, window_bounds = array<i64: 1, 8, 8, 32>}]} {
    %c0_i32 = arith.constant 0 : i32
    %0 = arith.cmpi eq, %arg1, %c0_i32 : i32
    %1 = arith.extui %0 : i1 to i32
    %c0_i32_0 = arith.constant 0 : i32
    %2 = arith.cmpi ne, %1, %c0_i32_0 : i32
    scf.if %2 {
      %cst_102 = arith.constant 0.000000e+00 : f32
      %346 = vector.broadcast %cst_102 : f32 to vector<8x32xf32>
      %c0_103 = arith.constant 0 : index
      %c0_104 = arith.constant 0 : index
      %347 = vector.load %arg9[%c0_103, %c0_104] : memref<8x32xf32, #tpu.memory_space<vmem>>, vector<8x32xf32>
      tpu.vector_store %arg9[%c0_103, %c0_104], %346 {strides = array<i32>} : memref<8x32xf32, #tpu.memory_space<vmem>>, vector<8x32xf32>,
    } else {
    }
    %3 = arith.index_cast %arg0 : i32 to index
    %c0 = arith.constant 0 : index
    %c0_1 = arith.constant 0 : index
    %c0_2 = arith.constant 0 : index
    %4 = vector.load %arg3[%3, %c0, %c0_1, %c0_2] : memref<2x1x16x96xf32, #tpu.memory_space<vmem>>, vector<1x1x16x96xf32>
    %5 = vector.shape_cast %4 : vector<1x1x16x96xf32> to vector<1x16x96xf32>
    %c0_3 = arith.constant 0 : index
    %c0_4 = arith.constant 0 : index
    %c0_5 = arith.constant 0 : index
    %c0_6 = arith.constant 0 : index
    %6 = vector.load %arg2[%c0_3, %c0_4, %c0_5, %c0_6] : memref<1x8x8x16xf32, #tpu.memory_space<vmem>>, vector<1x8x8x16xf32>
    %7 = vector.shape_cast %6 : vector<1x8x8x16xf32> to vector<8x8x16xf32>
    %8 = vector.shape_cast %7 : vector<8x8x16xf32> to vector<64x16xf32>
    %9 = vector.shape_cast %5 : vector<1x16x96xf32> to vector<16x96xf32>
    %cst = arith.constant dense<0.000000e+00> : vector<64x96xf32>
    %10 = tpu.matmul %8, %9, %cst {dimension_numbers = #tpu.dot_dimension_numbers<[1], [0], [0], [1], [0, 0, 1, 1], [], []>} : vector<64x16xf32>, vector<16x96xf32>, vector<64x96xf32> -> vector<64x96xf32>
    %c0_7 = arith.constant 0 : index
    %c0_8 = arith.constant 0 : index
    %11 = vector.load %arg10[%c0_7, %c0_8] : memref<64x96xf32, #tpu.memory_space<vmem>>, vector<64x96xf32>
    tpu.vector_store %arg10[%c0_7, %c0_8], %10 {strides = array<i32>} : memref<64x96xf32, #tpu.memory_space<vmem>>, vector<64x96xf32>,
    %12 = arith.index_cast %arg0 : i32 to index
    %c0_9 = arith.constant 0 : index
    %c0_10 = arith.constant 0 : index
    %13 = vector.load %arg4[%12, %c0_9, %c0_10] : memref<2x32x96xf32, #tpu.memory_space<vmem>>, vector<1x32x96xf32>
    %14 = vector.shape_cast %13 : vector<1x32x96xf32> to vector<32x96xf32>
    %15 = arith.index_cast %arg0 : i32 to index
    %c0_11 = arith.constant 0 : index
    %c0_12 = arith.constant 0 : index
    %16 = vector.load %arg5[%15, %c0_11, %c0_12] : memref<2x1x64xf32, #tpu.memory_space<vmem>>, vector<1x1x64xf32>
    %17 = vector.shape_cast %16 : vector<1x1x64xf32> to vector<1x64xf32>
    %18 = arith.index_cast %arg0 : i32 to index
    %c0_13 = arith.constant 0 : index
    %c0_14 = arith.constant 0 : index
    %19 = vector.load %arg6[%18, %c0_13, %c0_14] : memref<2x1x32xf32, #tpu.memory_space<vmem>>, vector<1x1x32xf32>
    %20 = vector.shape_cast %19 : vector<1x1x32xf32> to vector<1x32xf32>
    %21 = arith.index_cast %arg0 : i32 to index
    %c0_15 = arith.constant 0 : index
    %c0_16 = arith.constant 0 : index
    %22 = vector.load %arg7[%21, %c0_15, %c0_16] : memref<2x1x32xf32, #tpu.memory_space<vmem>>, vector<1x1x32xf32>
    %23 = vector.shape_cast %22 : vector<1x1x32xf32> to vector<1x32xf32>
    %c0_17 = arith.constant 0 : index
    %c0_18 = arith.constant 0 : index
    %24 = vector.load %arg9[%c0_17, %c0_18] : memref<8x32xf32, #tpu.memory_space<vmem>>, vector<8x32xf32>
    %c0_i32_19 = arith.constant 0 : i32
    %c1_i32 = arith.constant 1 : i32
    %25 = arith.subi %c1_i32, %arg0 : i32
    %26 = arith.muli %25, %c0_i32_19 : i32
    %c7_i32 = arith.constant 7 : i32
    %27 = arith.subi %c7_i32, %c0_i32_19 : i32
    %28 = arith.muli %arg0, %27 : i32
    %29 = arith.addi %26, %28 : i32
    %c8_i32 = arith.constant 8 : i32
    %30 = arith.muli %29, %c8_i32 : i32
    %31 = tpu.assume_multiple %30, 8 : i32
    %32 = arith.index_cast %31 : i32 to index
    %c0_20 = arith.constant 0 : index
    %33 = vector.load %arg10[%32, %c0_20] : memref<64x96xf32, #tpu.memory_space<vmem>>, vector<8x96xf32>
    %cst_21 = arith.constant dense<0.000000e+00> : vector<8x96xf32>
    %34 = tpu.matmul %24, %14, %cst_21 {dimension_numbers = #tpu.dot_dimension_numbers<[1], [0], [0], [1], [0, 0, 1, 1], [], []>} : vector<8x32xf32>, vector<32x96xf32>, vector<8x96xf32> -> vector<8x96xf32>
    %35 = vector.extract_strided_slice %33 {offsets = [0, 0], sizes = [8, 64], strides = [1, 1]} : vector<8x96xf32> to vector<8x64xf32>
    %36 = vector.extract_strided_slice %34 {offsets = [0, 0], sizes = [8, 64], strides = [1, 1]} : vector<8x96xf32> to vector<8x64xf32>
    %37 = arith.addf %35, %36 : vector<8x64xf32>
    %38 = vector.broadcast %17 : vector<1x64xf32> to vector<8x64xf32>
    %39 = arith.addf %37, %38 : vector<8x64xf32>
    %40 = arith.negf %39 : vector<8x64xf32>
    %41 = math.exp %40 : vector<8x64xf32>
    %cst_22 = arith.constant 1.000000e+00 : f32
    %42 = vector.broadcast %cst_22 : f32 to vector<8x64xf32>
    %43 = arith.addf %42, %41 : vector<8x64xf32>
    %44 = arith.divf %42, %43 : vector<8x64xf32>
    %45 = vector.extract_strided_slice %44 {offsets = [0, 0], sizes = [8, 32], strides = [1, 1]} : vector<8x64xf32> to vector<8x32xf32>
    %46 = vector.extract_strided_slice %44 {offsets = [0, 32], sizes = [8, 32], strides = [1, 1]} : vector<8x64xf32> to vector<8x32xf32>
    %47 = vector.extract_strided_slice %33 {offsets = [0, 64], sizes = [8, 32], strides = [1, 1]} : vector<8x96xf32> to vector<8x32xf32>
    %48 = vector.broadcast %20 : vector<1x32xf32> to vector<8x32xf32>
    %49 = arith.addf %47, %48 : vector<8x32xf32>
    %50 = vector.extract_strided_slice %34 {offsets = [0, 64], sizes = [8, 32], strides = [1, 1]} : vector<8x96xf32> to vector<8x32xf32>
    %51 = vector.broadcast %23 : vector<1x32xf32> to vector<8x32xf32>
    %52 = arith.addf %50, %51 : vector<8x32xf32>
    %53 = arith.mulf %45, %52 : vector<8x32xf32>
    %54 = arith.addf %49, %53 : vector<8x32xf32>
    %55 = math.tanh %54 : vector<8x32xf32>
    %cst_23 = arith.constant 1.000000e+00 : f32
    %56 = vector.broadcast %cst_23 : f32 to vector<8x32xf32>
    %57 = arith.subf %56, %46 : vector<8x32xf32>
    %58 = arith.mulf %57, %55 : vector<8x32xf32>
    %59 = arith.mulf %46, %24 : vector<8x32xf32>
    %60 = arith.addf %58, %59 : vector<8x32xf32>
    %c0_24 = arith.constant 0 : index
    %61 = arith.index_cast %29 : i32 to index
    %c0_25 = arith.constant 0 : index
    %c0_26 = arith.constant 0 : index
    %62 = vector.load %arg8[%c0_24, %61, %c0_25, %c0_26] : memref<1x8x8x32xf32, #tpu.memory_space<vmem>>, vector<1x1x8x32xf32>
    %63 = vector.shape_cast %62 : vector<1x1x8x32xf32> to vector<8x32xf32>
    %64 = vector.shape_cast %60 : vector<8x32xf32> to vector<1x1x8x32xf32>
    tpu.vector_store %arg8[%c0_24, %61, %c0_25, %c0_26], %64 {strides = array<i32>} : memref<1x8x8x32xf32, #tpu.memory_space<vmem>>, vector<1x1x8x32xf32>,
    %c1_i32_27 = arith.constant 1 : i32
    %c1_i32_28 = arith.constant 1 : i32
    %65 = arith.subi %c1_i32_28, %arg0 : i32
    %66 = arith.muli %65, %c1_i32_27 : i32
    %c7_i32_29 = arith.constant 7 : i32
    %67 = arith.subi %c7_i32_29, %c1_i32_27 : i32
    %68 = arith.muli %arg0, %67 : i32
    %69 = arith.addi %66, %68 : i32
    %c8_i32_30 = arith.constant 8 : i32
    %70 = arith.muli %69, %c8_i32_30 : i32
    %71 = tpu.assume_multiple %70, 8 : i32
    %72 = arith.index_cast %71 : i32 to index
    %c0_31 = arith.constant 0 : index
    %73 = vector.load %arg10[%72, %c0_31] : memref<64x96xf32, #tpu.memory_space<vmem>>, vector<8x96xf32>
    %cst_32 = arith.constant dense<0.000000e+00> : vector<8x96xf32>
    %74 = tpu.matmul %60, %14, %cst_32 {dimension_numbers = #tpu.dot_dimension_numbers<[1], [0], [0], [1], [0, 0, 1, 1], [], []>} : vector<8x32xf32>, vector<32x96xf32>, vector<8x96xf32> -> vector<8x96xf32>
    %75 = vector.extract_strided_slice %73 {offsets = [0, 0], sizes = [8, 64], strides = [1, 1]} : vector<8x96xf32> to vector<8x64xf32>
    %76 = vector.extract_strided_slice %74 {offsets = [0, 0], sizes = [8, 64], strides = [1, 1]} : vector<8x96xf32> to vector<8x64xf32>
    %77 = arith.addf %75, %76 : vector<8x64xf32>
    %78 = vector.broadcast %17 : vector<1x64xf32> to vector<8x64xf32>
    %79 = arith.addf %77, %78 : vector<8x64xf32>
    %80 = arith.negf %79 : vector<8x64xf32>
    %81 = math.exp %80 : vector<8x64xf32>
    %cst_33 = arith.constant 1.000000e+00 : f32
    %82 = vector.broadcast %cst_33 : f32 to vector<8x64xf32>
    %83 = arith.addf %82, %81 : vector<8x64xf32>
    %84 = arith.divf %82, %83 : vector<8x64xf32>
    %85 = vector.extract_strided_slice %84 {offsets = [0, 0], sizes = [8, 32], strides = [1, 1]} : vector<8x64xf32> to vector<8x32xf32>
    %86 = vector.extract_strided_slice %84 {offsets = [0, 32], sizes = [8, 32], strides = [1, 1]} : vector<8x64xf32> to vector<8x32xf32>
    %87 = vector.extract_strided_slice %73 {offsets = [0, 64], sizes = [8, 32], strides = [1, 1]} : vector<8x96xf32> to vector<8x32xf32>
    %88 = vector.broadcast %20 : vector<1x32xf32> to vector<8x32xf32>
    %89 = arith.addf %87, %88 : vector<8x32xf32>
    %90 = vector.extract_strided_slice %74 {offsets = [0, 64], sizes = [8, 32], strides = [1, 1]} : vector<8x96xf32> to vector<8x32xf32>
    %91 = vector.broadcast %23 : vector<1x32xf32> to vector<8x32xf32>
    %92 = arith.addf %90, %91 : vector<8x32xf32>
    %93 = arith.mulf %85, %92 : vector<8x32xf32>
    %94 = arith.addf %89, %93 : vector<8x32xf32>
    %95 = math.tanh %94 : vector<8x32xf32>
    %cst_34 = arith.constant 1.000000e+00 : f32
    %96 = vector.broadcast %cst_34 : f32 to vector<8x32xf32>
    %97 = arith.subf %96, %86 : vector<8x32xf32>
    %98 = arith.mulf %97, %95 : vector<8x32xf32>
    %99 = arith.mulf %86, %60 : vector<8x32xf32>
    %100 = arith.addf %98, %99 : vector<8x32xf32>
    %c0_35 = arith.constant 0 : index
    %101 = arith.index_cast %69 : i32 to index
    %c0_36 = arith.constant 0 : index
    %c0_37 = arith.constant 0 : index
    %102 = vector.load %arg8[%c0_35, %101, %c0_36, %c0_37] : memref<1x8x8x32xf32, #tpu.memory_space<vmem>>, vector<1x1x8x32xf32>
    %103 = vector.shape_cast %102 : vector<1x1x8x32xf32> to vector<8x32xf32>
    %104 = vector.shape_cast %100 : vector<8x32xf32> to vector<1x1x8x32xf32>
    tpu.vector_store %arg8[%c0_35, %101, %c0_36, %c0_37], %104 {strides = array<i32>} : memref<1x8x8x32xf32, #tpu.memory_space<vmem>>, vector<1x1x8x32xf32>,
    %c2_i32 = arith.constant 2 : i32
    %c1_i32_38 = arith.constant 1 : i32
    %105 = arith.subi %c1_i32_38, %arg0 : i32
    %106 = arith.muli %105, %c2_i32 : i32
    %c7_i32_39 = arith.constant 7 : i32
    %107 = arith.subi %c7_i32_39, %c2_i32 : i32
    %108 = arith.muli %arg0, %107 : i32
    %109 = arith.addi %106, %108 : i32
    %c8_i32_40 = arith.constant 8 : i32
    %110 = arith.muli %109, %c8_i32_40 : i32
    %111 = tpu.assume_multiple %110, 8 : i32
    %112 = arith.index_cast %111 : i32 to index
    %c0_41 = arith.constant 0 : index
    %113 = vector.load %arg10[%112, %c0_41] : memref<64x96xf32, #tpu.memory_space<vmem>>, vector<8x96xf32>
    %cst_42 = arith.constant dense<0.000000e+00> : vector<8x96xf32>
    %114 = tpu.matmul %100, %14, %cst_42 {dimension_numbers = #tpu.dot_dimension_numbers<[1], [0], [0], [1], [0, 0, 1, 1], [], []>} : vector<8x32xf32>, vector<32x96xf32>, vector<8x96xf32> -> vector<8x96xf32>
    %115 = vector.extract_strided_slice %113 {offsets = [0, 0], sizes = [8, 64], strides = [1, 1]} : vector<8x96xf32> to vector<8x64xf32>
    %116 = vector.extract_strided_slice %114 {offsets = [0, 0], sizes = [8, 64], strides = [1, 1]} : vector<8x96xf32> to vector<8x64xf32>
    %117 = arith.addf %115, %116 : vector<8x64xf32>
    %118 = vector.broadcast %17 : vector<1x64xf32> to vector<8x64xf32>
    %119 = arith.addf %117, %118 : vector<8x64xf32>
    %120 = arith.negf %119 : vector<8x64xf32>
    %121 = math.exp %120 : vector<8x64xf32>
    %cst_43 = arith.constant 1.000000e+00 : f32
    %122 = vector.broadcast %cst_43 : f32 to vector<8x64xf32>
    %123 = arith.addf %122, %121 : vector<8x64xf32>
    %124 = arith.divf %122, %123 : vector<8x64xf32>
    %125 = vector.extract_strided_slice %124 {offsets = [0, 0], sizes = [8, 32], strides = [1, 1]} : vector<8x64xf32> to vector<8x32xf32>
    %126 = vector.extract_strided_slice %124 {offsets = [0, 32], sizes = [8, 32], strides = [1, 1]} : vector<8x64xf32> to vector<8x32xf32>
    %127 = vector.extract_strided_slice %113 {offsets = [0, 64], sizes = [8, 32], strides = [1, 1]} : vector<8x96xf32> to vector<8x32xf32>
    %128 = vector.broadcast %20 : vector<1x32xf32> to vector<8x32xf32>
    %129 = arith.addf %127, %128 : vector<8x32xf32>
    %130 = vector.extract_strided_slice %114 {offsets = [0, 64], sizes = [8, 32], strides = [1, 1]} : vector<8x96xf32> to vector<8x32xf32>
    %131 = vector.broadcast %23 : vector<1x32xf32> to vector<8x32xf32>
    %132 = arith.addf %130, %131 : vector<8x32xf32>
    %133 = arith.mulf %125, %132 : vector<8x32xf32>
    %134 = arith.addf %129, %133 : vector<8x32xf32>
    %135 = math.tanh %134 : vector<8x32xf32>
    %cst_44 = arith.constant 1.000000e+00 : f32
    %136 = vector.broadcast %cst_44 : f32 to vector<8x32xf32>
    %137 = arith.subf %136, %126 : vector<8x32xf32>
    %138 = arith.mulf %137, %135 : vector<8x32xf32>
    %139 = arith.mulf %126, %100 : vector<8x32xf32>
    %140 = arith.addf %138, %139 : vector<8x32xf32>
    %c0_45 = arith.constant 0 : index
    %141 = arith.index_cast %109 : i32 to index
    %c0_46 = arith.constant 0 : index
    %c0_47 = arith.constant 0 : index
    %142 = vector.load %arg8[%c0_45, %141, %c0_46, %c0_47] : memref<1x8x8x32xf32, #tpu.memory_space<vmem>>, vector<1x1x8x32xf32>
    %143 = vector.shape_cast %142 : vector<1x1x8x32xf32> to vector<8x32xf32>
    %144 = vector.shape_cast %140 : vector<8x32xf32> to vector<1x1x8x32xf32>
    tpu.vector_store %arg8[%c0_45, %141, %c0_46, %c0_47], %144 {strides = array<i32>} : memref<1x8x8x32xf32, #tpu.memory_space<vmem>>, vector<1x1x8x32xf32>,
    %c3_i32 = arith.constant 3 : i32
    %c1_i32_48 = arith.constant 1 : i32
    %145 = arith.subi %c1_i32_48, %arg0 : i32
    %146 = arith.muli %145, %c3_i32 : i32
    %c7_i32_49 = arith.constant 7 : i32
    %147 = arith.subi %c7_i32_49, %c3_i32 : i32
    %148 = arith.muli %arg0, %147 : i32
    %149 = arith.addi %146, %148 : i32
    %c8_i32_50 = arith.constant 8 : i32
    %150 = arith.muli %149, %c8_i32_50 : i32
    %151 = tpu.assume_multiple %150, 8 : i32
    %152 = arith.index_cast %151 : i32 to index
    %c0_51 = arith.constant 0 : index
    %153 = vector.load %arg10[%152, %c0_51] : memref<64x96xf32, #tpu.memory_space<vmem>>, vector<8x96xf32>
    %cst_52 = arith.constant dense<0.000000e+00> : vector<8x96xf32>
    %154 = tpu.matmul %140, %14, %cst_52 {dimension_numbers = #tpu.dot_dimension_numbers<[1], [0], [0], [1], [0, 0, 1, 1], [], []>} : vector<8x32xf32>, vector<32x96xf32>, vector<8x96xf32> -> vector<8x96xf32>
    %155 = vector.extract_strided_slice %153 {offsets = [0, 0], sizes = [8, 64], strides = [1, 1]} : vector<8x96xf32> to vector<8x64xf32>
    %156 = vector.extract_strided_slice %154 {offsets = [0, 0], sizes = [8, 64], strides = [1, 1]} : vector<8x96xf32> to vector<8x64xf32>
    %157 = arith.addf %155, %156 : vector<8x64xf32>
    %158 = vector.broadcast %17 : vector<1x64xf32> to vector<8x64xf32>
    %159 = arith.addf %157, %158 : vector<8x64xf32>
    %160 = arith.negf %159 : vector<8x64xf32>
    %161 = math.exp %160 : vector<8x64xf32>
    %cst_53 = arith.constant 1.000000e+00 : f32
    %162 = vector.broadcast %cst_53 : f32 to vector<8x64xf32>
    %163 = arith.addf %162, %161 : vector<8x64xf32>
    %164 = arith.divf %162, %163 : vector<8x64xf32>
    %165 = vector.extract_strided_slice %164 {offsets = [0, 0], sizes = [8, 32], strides = [1, 1]} : vector<8x64xf32> to vector<8x32xf32>
    %166 = vector.extract_strided_slice %164 {offsets = [0, 32], sizes = [8, 32], strides = [1, 1]} : vector<8x64xf32> to vector<8x32xf32>
    %167 = vector.extract_strided_slice %153 {offsets = [0, 64], sizes = [8, 32], strides = [1, 1]} : vector<8x96xf32> to vector<8x32xf32>
    %168 = vector.broadcast %20 : vector<1x32xf32> to vector<8x32xf32>
    %169 = arith.addf %167, %168 : vector<8x32xf32>
    %170 = vector.extract_strided_slice %154 {offsets = [0, 64], sizes = [8, 32], strides = [1, 1]} : vector<8x96xf32> to vector<8x32xf32>
    %171 = vector.broadcast %23 : vector<1x32xf32> to vector<8x32xf32>
    %172 = arith.addf %170, %171 : vector<8x32xf32>
    %173 = arith.mulf %165, %172 : vector<8x32xf32>
    %174 = arith.addf %169, %173 : vector<8x32xf32>
    %175 = math.tanh %174 : vector<8x32xf32>
    %cst_54 = arith.constant 1.000000e+00 : f32
    %176 = vector.broadcast %cst_54 : f32 to vector<8x32xf32>
    %177 = arith.subf %176, %166 : vector<8x32xf32>
    %178 = arith.mulf %177, %175 : vector<8x32xf32>
    %179 = arith.mulf %166, %140 : vector<8x32xf32>
    %180 = arith.addf %178, %179 : vector<8x32xf32>
    %c0_55 = arith.constant 0 : index
    %181 = arith.index_cast %149 : i32 to index
    %c0_56 = arith.constant 0 : index
    %c0_57 = arith.constant 0 : index
    %182 = vector.load %arg8[%c0_55, %181, %c0_56, %c0_57] : memref<1x8x8x32xf32, #tpu.memory_space<vmem>>, vector<1x1x8x32xf32>
    %183 = vector.shape_cast %182 : vector<1x1x8x32xf32> to vector<8x32xf32>
    %184 = vector.shape_cast %180 : vector<8x32xf32> to vector<1x1x8x32xf32>
    tpu.vector_store %arg8[%c0_55, %181, %c0_56, %c0_57], %184 {strides = array<i32>} : memref<1x8x8x32xf32, #tpu.memory_space<vmem>>, vector<1x1x8x32xf32>,
    %c4_i32 = arith.constant 4 : i32
    %c1_i32_58 = arith.constant 1 : i32
    %185 = arith.subi %c1_i32_58, %arg0 : i32
    %186 = arith.muli %185, %c4_i32 : i32
    %c7_i32_59 = arith.constant 7 : i32
    %187 = arith.subi %c7_i32_59, %c4_i32 : i32
    %188 = arith.muli %arg0, %187 : i32
    %189 = arith.addi %186, %188 : i32
    %c8_i32_60 = arith.constant 8 : i32
    %190 = arith.muli %189, %c8_i32_60 : i32
    %191 = tpu.assume_multiple %190, 8 : i32
    %192 = arith.index_cast %191 : i32 to index
    %c0_61 = arith.constant 0 : index
    %193 = vector.load %arg10[%192, %c0_61] : memref<64x96xf32, #tpu.memory_space<vmem>>, vector<8x96xf32>
    %cst_62 = arith.constant dense<0.000000e+00> : vector<8x96xf32>
    %194 = tpu.matmul %180, %14, %cst_62 {dimension_numbers = #tpu.dot_dimension_numbers<[1], [0], [0], [1], [0, 0, 1, 1], [], []>} : vector<8x32xf32>, vector<32x96xf32>, vector<8x96xf32> -> vector<8x96xf32>
    %195 = vector.extract_strided_slice %193 {offsets = [0, 0], sizes = [8, 64], strides = [1, 1]} : vector<8x96xf32> to vector<8x64xf32>
    %196 = vector.extract_strided_slice %194 {offsets = [0, 0], sizes = [8, 64], strides = [1, 1]} : vector<8x96xf32> to vector<8x64xf32>
    %197 = arith.addf %195, %196 : vector<8x64xf32>
    %198 = vector.broadcast %17 : vector<1x64xf32> to vector<8x64xf32>
    %199 = arith.addf %197, %198 : vector<8x64xf32>
    %200 = arith.negf %199 : vector<8x64xf32>
    %201 = math.exp %200 : vector<8x64xf32>
    %cst_63 = arith.constant 1.000000e+00 : f32
    %202 = vector.broadcast %cst_63 : f32 to vector<8x64xf32>
    %203 = arith.addf %202, %201 : vector<8x64xf32>
    %204 = arith.divf %202, %203 : vector<8x64xf32>
    %205 = vector.extract_strided_slice %204 {offsets = [0, 0], sizes = [8, 32], strides = [1, 1]} : vector<8x64xf32> to vector<8x32xf32>
    %206 = vector.extract_strided_slice %204 {offsets = [0, 32], sizes = [8, 32], strides = [1, 1]} : vector<8x64xf32> to vector<8x32xf32>
    %207 = vector.extract_strided_slice %193 {offsets = [0, 64], sizes = [8, 32], strides = [1, 1]} : vector<8x96xf32> to vector<8x32xf32>
    %208 = vector.broadcast %20 : vector<1x32xf32> to vector<8x32xf32>
    %209 = arith.addf %207, %208 : vector<8x32xf32>
    %210 = vector.extract_strided_slice %194 {offsets = [0, 64], sizes = [8, 32], strides = [1, 1]} : vector<8x96xf32> to vector<8x32xf32>
    %211 = vector.broadcast %23 : vector<1x32xf32> to vector<8x32xf32>
    %212 = arith.addf %210, %211 : vector<8x32xf32>
    %213 = arith.mulf %205, %212 : vector<8x32xf32>
    %214 = arith.addf %209, %213 : vector<8x32xf32>
    %215 = math.tanh %214 : vector<8x32xf32>
    %cst_64 = arith.constant 1.000000e+00 : f32
    %216 = vector.broadcast %cst_64 : f32 to vector<8x32xf32>
    %217 = arith.subf %216, %206 : vector<8x32xf32>
    %218 = arith.mulf %217, %215 : vector<8x32xf32>
    %219 = arith.mulf %206, %180 : vector<8x32xf32>
    %220 = arith.addf %218, %219 : vector<8x32xf32>
    %c0_65 = arith.constant 0 : index
    %221 = arith.index_cast %189 : i32 to index
    %c0_66 = arith.constant 0 : index
    %c0_67 = arith.constant 0 : index
    %222 = vector.load %arg8[%c0_65, %221, %c0_66, %c0_67] : memref<1x8x8x32xf32, #tpu.memory_space<vmem>>, vector<1x1x8x32xf32>
    %223 = vector.shape_cast %222 : vector<1x1x8x32xf32> to vector<8x32xf32>
    %224 = vector.shape_cast %220 : vector<8x32xf32> to vector<1x1x8x32xf32>
    tpu.vector_store %arg8[%c0_65, %221, %c0_66, %c0_67], %224 {strides = array<i32>} : memref<1x8x8x32xf32, #tpu.memory_space<vmem>>, vector<1x1x8x32xf32>,
    %c5_i32 = arith.constant 5 : i32
    %c1_i32_68 = arith.constant 1 : i32
    %225 = arith.subi %c1_i32_68, %arg0 : i32
    %226 = arith.muli %225, %c5_i32 : i32
    %c7_i32_69 = arith.constant 7 : i32
    %227 = arith.subi %c7_i32_69, %c5_i32 : i32
    %228 = arith.muli %arg0, %227 : i32
    %229 = arith.addi %226, %228 : i32
    %c8_i32_70 = arith.constant 8 : i32
    %230 = arith.muli %229, %c8_i32_70 : i32
    %231 = tpu.assume_multiple %230, 8 : i32
    %232 = arith.index_cast %231 : i32 to index
    %c0_71 = arith.constant 0 : index
    %233 = vector.load %arg10[%232, %c0_71] : memref<64x96xf32, #tpu.memory_space<vmem>>, vector<8x96xf32>
    %cst_72 = arith.constant dense<0.000000e+00> : vector<8x96xf32>
    %234 = tpu.matmul %220, %14, %cst_72 {dimension_numbers = #tpu.dot_dimension_numbers<[1], [0], [0], [1], [0, 0, 1, 1], [], []>} : vector<8x32xf32>, vector<32x96xf32>, vector<8x96xf32> -> vector<8x96xf32>
    %235 = vector.extract_strided_slice %233 {offsets = [0, 0], sizes = [8, 64], strides = [1, 1]} : vector<8x96xf32> to vector<8x64xf32>
    %236 = vector.extract_strided_slice %234 {offsets = [0, 0], sizes = [8, 64], strides = [1, 1]} : vector<8x96xf32> to vector<8x64xf32>
    %237 = arith.addf %235, %236 : vector<8x64xf32>
    %238 = vector.broadcast %17 : vector<1x64xf32> to vector<8x64xf32>
    %239 = arith.addf %237, %238 : vector<8x64xf32>
    %240 = arith.negf %239 : vector<8x64xf32>
    %241 = math.exp %240 : vector<8x64xf32>
    %cst_73 = arith.constant 1.000000e+00 : f32
    %242 = vector.broadcast %cst_73 : f32 to vector<8x64xf32>
    %243 = arith.addf %242, %241 : vector<8x64xf32>
    %244 = arith.divf %242, %243 : vector<8x64xf32>
    %245 = vector.extract_strided_slice %244 {offsets = [0, 0], sizes = [8, 32], strides = [1, 1]} : vector<8x64xf32> to vector<8x32xf32>
    %246 = vector.extract_strided_slice %244 {offsets = [0, 32], sizes = [8, 32], strides = [1, 1]} : vector<8x64xf32> to vector<8x32xf32>
    %247 = vector.extract_strided_slice %233 {offsets = [0, 64], sizes = [8, 32], strides = [1, 1]} : vector<8x96xf32> to vector<8x32xf32>
    %248 = vector.broadcast %20 : vector<1x32xf32> to vector<8x32xf32>
    %249 = arith.addf %247, %248 : vector<8x32xf32>
    %250 = vector.extract_strided_slice %234 {offsets = [0, 64], sizes = [8, 32], strides = [1, 1]} : vector<8x96xf32> to vector<8x32xf32>
    %251 = vector.broadcast %23 : vector<1x32xf32> to vector<8x32xf32>
    %252 = arith.addf %250, %251 : vector<8x32xf32>
    %253 = arith.mulf %245, %252 : vector<8x32xf32>
    %254 = arith.addf %249, %253 : vector<8x32xf32>
    %255 = math.tanh %254 : vector<8x32xf32>
    %cst_74 = arith.constant 1.000000e+00 : f32
    %256 = vector.broadcast %cst_74 : f32 to vector<8x32xf32>
    %257 = arith.subf %256, %246 : vector<8x32xf32>
    %258 = arith.mulf %257, %255 : vector<8x32xf32>
    %259 = arith.mulf %246, %220 : vector<8x32xf32>
    %260 = arith.addf %258, %259 : vector<8x32xf32>
    %c0_75 = arith.constant 0 : index
    %261 = arith.index_cast %229 : i32 to index
    %c0_76 = arith.constant 0 : index
    %c0_77 = arith.constant 0 : index
    %262 = vector.load %arg8[%c0_75, %261, %c0_76, %c0_77] : memref<1x8x8x32xf32, #tpu.memory_space<vmem>>, vector<1x1x8x32xf32>
    %263 = vector.shape_cast %262 : vector<1x1x8x32xf32> to vector<8x32xf32>
    %264 = vector.shape_cast %260 : vector<8x32xf32> to vector<1x1x8x32xf32>
    tpu.vector_store %arg8[%c0_75, %261, %c0_76, %c0_77], %264 {strides = array<i32>} : memref<1x8x8x32xf32, #tpu.memory_space<vmem>>, vector<1x1x8x32xf32>,
    %c6_i32 = arith.constant 6 : i32
    %c1_i32_78 = arith.constant 1 : i32
    %265 = arith.subi %c1_i32_78, %arg0 : i32
    %266 = arith.muli %265, %c6_i32 : i32
    %c7_i32_79 = arith.constant 7 : i32
    %267 = arith.subi %c7_i32_79, %c6_i32 : i32
    %268 = arith.muli %arg0, %267 : i32
    %269 = arith.addi %266, %268 : i32
    %c8_i32_80 = arith.constant 8 : i32
    %270 = arith.muli %269, %c8_i32_80 : i32
    %271 = tpu.assume_multiple %270, 8 : i32
    %272 = arith.index_cast %271 : i32 to index
    %c0_81 = arith.constant 0 : index
    %273 = vector.load %arg10[%272, %c0_81] : memref<64x96xf32, #tpu.memory_space<vmem>>, vector<8x96xf32>
    %cst_82 = arith.constant dense<0.000000e+00> : vector<8x96xf32>
    %274 = tpu.matmul %260, %14, %cst_82 {dimension_numbers = #tpu.dot_dimension_numbers<[1], [0], [0], [1], [0, 0, 1, 1], [], []>} : vector<8x32xf32>, vector<32x96xf32>, vector<8x96xf32> -> vector<8x96xf32>
    %275 = vector.extract_strided_slice %273 {offsets = [0, 0], sizes = [8, 64], strides = [1, 1]} : vector<8x96xf32> to vector<8x64xf32>
    %276 = vector.extract_strided_slice %274 {offsets = [0, 0], sizes = [8, 64], strides = [1, 1]} : vector<8x96xf32> to vector<8x64xf32>
    %277 = arith.addf %275, %276 : vector<8x64xf32>
    %278 = vector.broadcast %17 : vector<1x64xf32> to vector<8x64xf32>
    %279 = arith.addf %277, %278 : vector<8x64xf32>
    %280 = arith.negf %279 : vector<8x64xf32>
    %281 = math.exp %280 : vector<8x64xf32>
    %cst_83 = arith.constant 1.000000e+00 : f32
    %282 = vector.broadcast %cst_83 : f32 to vector<8x64xf32>
    %283 = arith.addf %282, %281 : vector<8x64xf32>
    %284 = arith.divf %282, %283 : vector<8x64xf32>
    %285 = vector.extract_strided_slice %284 {offsets = [0, 0], sizes = [8, 32], strides = [1, 1]} : vector<8x64xf32> to vector<8x32xf32>
    %286 = vector.extract_strided_slice %284 {offsets = [0, 32], sizes = [8, 32], strides = [1, 1]} : vector<8x64xf32> to vector<8x32xf32>
    %287 = vector.extract_strided_slice %273 {offsets = [0, 64], sizes = [8, 32], strides = [1, 1]} : vector<8x96xf32> to vector<8x32xf32>
    %288 = vector.broadcast %20 : vector<1x32xf32> to vector<8x32xf32>
    %289 = arith.addf %287, %288 : vector<8x32xf32>
    %290 = vector.extract_strided_slice %274 {offsets = [0, 64], sizes = [8, 32], strides = [1, 1]} : vector<8x96xf32> to vector<8x32xf32>
    %291 = vector.broadcast %23 : vector<1x32xf32> to vector<8x32xf32>
    %292 = arith.addf %290, %291 : vector<8x32xf32>
    %293 = arith.mulf %285, %292 : vector<8x32xf32>
    %294 = arith.addf %289, %293 : vector<8x32xf32>
    %295 = math.tanh %294 : vector<8x32xf32>
    %cst_84 = arith.constant 1.000000e+00 : f32
    %296 = vector.broadcast %cst_84 : f32 to vector<8x32xf32>
    %297 = arith.subf %296, %286 : vector<8x32xf32>
    %298 = arith.mulf %297, %295 : vector<8x32xf32>
    %299 = arith.mulf %286, %260 : vector<8x32xf32>
    %300 = arith.addf %298, %299 : vector<8x32xf32>
    %c0_85 = arith.constant 0 : index
    %301 = arith.index_cast %269 : i32 to index
    %c0_86 = arith.constant 0 : index
    %c0_87 = arith.constant 0 : index
    %302 = vector.load %arg8[%c0_85, %301, %c0_86, %c0_87] : memref<1x8x8x32xf32, #tpu.memory_space<vmem>>, vector<1x1x8x32xf32>
    %303 = vector.shape_cast %302 : vector<1x1x8x32xf32> to vector<8x32xf32>
    %304 = vector.shape_cast %300 : vector<8x32xf32> to vector<1x1x8x32xf32>
    tpu.vector_store %arg8[%c0_85, %301, %c0_86, %c0_87], %304 {strides = array<i32>} : memref<1x8x8x32xf32, #tpu.memory_space<vmem>>, vector<1x1x8x32xf32>,
    %c7_i32_88 = arith.constant 7 : i32
    %c1_i32_89 = arith.constant 1 : i32
    %305 = arith.subi %c1_i32_89, %arg0 : i32
    %306 = arith.muli %305, %c7_i32_88 : i32
    %c7_i32_90 = arith.constant 7 : i32
    %307 = arith.subi %c7_i32_90, %c7_i32_88 : i32
    %308 = arith.muli %arg0, %307 : i32
    %309 = arith.addi %306, %308 : i32
    %c8_i32_91 = arith.constant 8 : i32
    %310 = arith.muli %309, %c8_i32_91 : i32
    %311 = tpu.assume_multiple %310, 8 : i32
    %312 = arith.index_cast %311 : i32 to index
    %c0_92 = arith.constant 0 : index
    %313 = vector.load %arg10[%312, %c0_92] : memref<64x96xf32, #tpu.memory_space<vmem>>, vector<8x96xf32>
    %cst_93 = arith.constant dense<0.000000e+00> : vector<8x96xf32>
    %314 = tpu.matmul %300, %14, %cst_93 {dimension_numbers = #tpu.dot_dimension_numbers<[1], [0], [0], [1], [0, 0, 1, 1], [], []>} : vector<8x32xf32>, vector<32x96xf32>, vector<8x96xf32> -> vector<8x96xf32>
    %315 = vector.extract_strided_slice %313 {offsets = [0, 0], sizes = [8, 64], strides = [1, 1]} : vector<8x96xf32> to vector<8x64xf32>
    %316 = vector.extract_strided_slice %314 {offsets = [0, 0], sizes = [8, 64], strides = [1, 1]} : vector<8x96xf32> to vector<8x64xf32>
    %317 = arith.addf %315, %316 : vector<8x64xf32>
    %318 = vector.broadcast %17 : vector<1x64xf32> to vector<8x64xf32>
    %319 = arith.addf %317, %318 : vector<8x64xf32>
    %320 = arith.negf %319 : vector<8x64xf32>
    %321 = math.exp %320 : vector<8x64xf32>
    %cst_94 = arith.constant 1.000000e+00 : f32
    %322 = vector.broadcast %cst_94 : f32 to vector<8x64xf32>
    %323 = arith.addf %322, %321 : vector<8x64xf32>
    %324 = arith.divf %322, %323 : vector<8x64xf32>
    %325 = vector.extract_strided_slice %324 {offsets = [0, 0], sizes = [8, 32], strides = [1, 1]} : vector<8x64xf32> to vector<8x32xf32>
    %326 = vector.extract_strided_slice %324 {offsets = [0, 32], sizes = [8, 32], strides = [1, 1]} : vector<8x64xf32> to vector<8x32xf32>
    %327 = vector.extract_strided_slice %313 {offsets = [0, 64], sizes = [8, 32], strides = [1, 1]} : vector<8x96xf32> to vector<8x32xf32>
    %328 = vector.broadcast %20 : vector<1x32xf32> to vector<8x32xf32>
    %329 = arith.addf %327, %328 : vector<8x32xf32>
    %330 = vector.extract_strided_slice %314 {offsets = [0, 64], sizes = [8, 32], strides = [1, 1]} : vector<8x96xf32> to vector<8x32xf32>
    %331 = vector.broadcast %23 : vector<1x32xf32> to vector<8x32xf32>
    %332 = arith.addf %330, %331 : vector<8x32xf32>
    %333 = arith.mulf %325, %332 : vector<8x32xf32>
    %334 = arith.addf %329, %333 : vector<8x32xf32>
    %335 = math.tanh %334 : vector<8x32xf32>
    %cst_95 = arith.constant 1.000000e+00 : f32
    %336 = vector.broadcast %cst_95 : f32 to vector<8x32xf32>
    %337 = arith.subf %336, %326 : vector<8x32xf32>
    %338 = arith.mulf %337, %335 : vector<8x32xf32>
    %339 = arith.mulf %326, %300 : vector<8x32xf32>
    %340 = arith.addf %338, %339 : vector<8x32xf32>
    %c0_96 = arith.constant 0 : index
    %341 = arith.index_cast %309 : i32 to index
    %c0_97 = arith.constant 0 : index
    %c0_98 = arith.constant 0 : index
    %342 = vector.load %arg8[%c0_96, %341, %c0_97, %c0_98] : memref<1x8x8x32xf32, #tpu.memory_space<vmem>>, vector<1x1x8x32xf32>
    %343 = vector.shape_cast %342 : vector<1x1x8x32xf32> to vector<8x32xf32>
    %344 = vector.shape_cast %340 : vector<8x32xf32> to vector<1x1x8x32xf32>
    tpu.vector_store %arg8[%c0_96, %341, %c0_97, %c0_98], %344 {strides = array<i32>} : memref<1x8x8x32xf32, #tpu.memory_space<vmem>>, vector<1x1x8x32xf32>,
    %c8_i32_99 = arith.constant 8 : i32
    %c0_100 = arith.constant 0 : index
    %c0_101 = arith.constant 0 : index
    %345 = vector.load %arg9[%c0_100, %c0_101] : memref<8x32xf32, #tpu.memory_space<vmem>>, vector<8x32xf32>
    tpu.vector_store %arg9[%c0_100, %c0_101], %340 {strides = array<i32>} : memref<8x32xf32, #tpu.memory_space<vmem>>, vector<8x32xf32>,
    return
  }
  func.func @transform_0(%arg0: i32, %arg1: i32) -> (i32, i32, i32, i32) {
    %c1_i32 = arith.constant 1 : i32
    %0 = arith.subi %c1_i32, %arg0 : i32
    %1 = arith.muli %0, %arg1 : i32
    %c0_i32 = arith.constant 0 : i32
    %2 = arith.subi %c0_i32, %arg1 : i32
    %3 = arith.muli %arg0, %2 : i32
    %4 = arith.addi %1, %3 : i32
    %c0_i32_0 = arith.constant 0 : i32
    %c0_i32_1 = arith.constant 0 : i32
    %c0_i32_2 = arith.constant 0 : i32
    %c0_i32_3 = arith.constant 0 : i32
    return %c0_i32_0, %4, %c0_i32_1, %c0_i32_2 : i32, i32, i32, i32
  }
  func.func @transform_1(%arg0: i32, %arg1: i32) -> (i32, i32, i32, i32) {
    %c0_i32 = arith.constant 0 : i32
    %c0_i32_0 = arith.constant 0 : i32
    %c0_i32_1 = arith.constant 0 : i32
    %c0_i32_2 = arith.constant 0 : i32
    %c0_i32_3 = arith.constant 0 : i32
    return %c0_i32, %c0_i32_0, %c0_i32_1, %c0_i32_2 : i32, i32, i32, i32
  }
  func.func @transform_2(%arg0: i32, %arg1: i32) -> (i32, i32, i32) {
    %c0_i32 = arith.constant 0 : i32
    %c0_i32_0 = arith.constant 0 : i32
    %c0_i32_1 = arith.constant 0 : i32
    %c0_i32_2 = arith.constant 0 : i32
    return %c0_i32, %c0_i32_0, %c0_i32_1 : i32, i32, i32
  }
  func.func @transform_3(%arg0: i32, %arg1: i32) -> (i32, i32, i32) {
    %c0_i32 = arith.constant 0 : i32
    %c0_i32_0 = arith.constant 0 : i32
    %c0_i32_1 = arith.constant 0 : i32
    %c0_i32_2 = arith.constant 0 : i32
    return %c0_i32, %c0_i32_0, %c0_i32_1 : i32, i32, i32
  }
  func.func @transform_4(%arg0: i32, %arg1: i32) -> (i32, i32, i32) {
    %c0_i32 = arith.constant 0 : i32
    %c0_i32_0 = arith.constant 0 : i32
    %c0_i32_1 = arith.constant 0 : i32
    %c0_i32_2 = arith.constant 0 : i32
    return %c0_i32, %c0_i32_0, %c0_i32_1 : i32, i32, i32
  }
  func.func @transform_5(%arg0: i32, %arg1: i32) -> (i32, i32, i32) {
    %c0_i32 = arith.constant 0 : i32
    %c0_i32_0 = arith.constant 0 : i32
    %c0_i32_1 = arith.constant 0 : i32
    %c0_i32_2 = arith.constant 0 : i32
    return %c0_i32, %c0_i32_0, %c0_i32_1 : i32, i32, i32
  }
  func.func @transform_6(%arg0: i32, %arg1: i32) -> (i32, i32, i32, i32) {
    %c1_i32 = arith.constant 1 : i32
    %0 = arith.subi %c1_i32, %arg0 : i32
    %1 = arith.muli %0, %arg1 : i32
    %c0_i32 = arith.constant 0 : i32
    %2 = arith.subi %c0_i32, %arg1 : i32
    %3 = arith.muli %arg0, %2 : i32
    %4 = arith.addi %1, %3 : i32
    %c0_i32_0 = arith.constant 0 : i32
    %c0_i32_1 = arith.constant 0 : i32
    %c0_i32_2 = arith.constant 0 : i32
    return %arg0, %4, %c0_i32_0, %c0_i32_1 : i32, i32, i32, i32
  }
}

</mosaic_0001>

<bundles_post_ra>
// kernel: tpu_custom_call.1
= control target key start
LH: loop header
LB: loop body
LE: loop exit
PB: predicated region body
PF: predicated region fallthrough
CT: control target
= control target key end

     0   :  { %11 = vsyncpa [#allocation5], 0  ;;  %s2696_s0 = inlined_call_operand.hbm [shape: f32[1,8,8,16], index: 0, kind: input, shape index: {}]   ;;  %s2697_s1 = inlined_call_operand.hbm [shape: f32[2,1,16,96], index: 1, kind: input, shape index: {}]   ;;  %s2698_s2 = inlined_call_operand.hbm [shape: f32[2,32,96], index: 2, kind: input, shape index: {}]   ;;  %s2699_s3 = inlined_call_operand.vmem [shape: f32[2,1,64], index: 3, kind: input, shape index: {}]   ;;  %s2700_s4 = inlined_call_operand.vmem [shape: f32[2,1,32], index: 4, kind: input, shape index: {}]   ;;  %s2701_s5 = inlined_call_operand.vmem [shape: f32[2,1,32], index: 5, kind: input, shape index: {}]   ;;  %s2702_s6 = inlined_call_operand.hbm [shape: f32[2,8,8,32], index: 6, kind: output, shape index: {}]  }
   0x1   :  { %13 = vsyncpa [#allocation5 + $0x1], 0 }
   0x2   :  { %14 = vsyncpa [#allocation8], 0 }
   0x3   :  { %15 = vsyncpa [#allocation6], 0 }
   0x4   :  { %17 = vsyncpa [#allocation6 + $0x1], 0  ;;  %s2278_s21 = smov 0   ;;  %s2280_s22 = smov 0  }
   0x5   :  { %s2282_s23 = smov 0   ;;  %s2284_s24 = smov 0  }
   0x6   :  { %s2286_s25 = smov 0   ;;  %s2288_s26 = smov 0  }
   0x7 LB: > { %2709 = sst [smem:[#allocation14_spill]] %s2223_s25  ;;  %s1646_s27 = sadd.s32 4294967295, %s2227_s26   ;;  %s2227_s26 = sphi %s2288_s26, %s23_s26   ;;  %s2223_s25 = sphi %s2286_s25, %s2724_s25   ;;  %s2219_s24 = sphi %s2284_s24, %s2723_s24   ;;  %s2215_s23 = sphi %s2282_s23, %s2727_s23   ;;  %s2211_s22 = sphi %s2280_s22, %s2726_s22   ;;  %s2207_s21 = sphi %s2278_s21, %s2725_s21  }
   0x8   : > { %s1647_s28 = sadd.s32 4294967294, %s2227_s26   ;;  %s35_s29 = sadd.s32 1, %s2223_s25 }
   0x9   : > { %s195_s30 = sadd.s32 1, %s2215_s23  ;;  %p37_p0 = scmp.ge.s32.totalorder %s35_s29, 2 }
   0xa   : > { %p205_p1 = scmp.ne.s32.totalorder %s2215_s23, %s2211_s22  ;;  %p206_p2 = scmp.eq.s32.totalorder %s1646_s27, 1 }
   0xb   : > { %p211_p3 = scmp.ne.s32.totalorder %s2211_s22, %s2207_s21  ;;  %s2729_s29 = smov (%p37_p0, %s35_s29), 0 }
   0xc   : > { %2710 = sst [smem:[#allocation15_spill]] %s2729_s29  ;;  %p2318_p4 = por %p206_p2, %p205_p1 }
   0xd   : > { %p212_p5 = scmp.eq.s32.totalorder %s1647_s28, 1  ;;  %s190_s8 = ssub.s32 %s2223_s25, %s2729_s29 }
   0xe   : > { %s2711_s7 = scalar_select %p2318_p4, 1, 0 }
   0xf   : > { %p1648_p6 = scmp.ge.s32.totalorder %s2227_s26, 1  ;;  %p193_p7 = scmp.eq.s32.totalorder %s190_s8, 0 }
  0x10   : > { %p2325_p8 = por %p212_p5, %p211_p3  ;;  %p219_p9 = scmp.lt.s32.totalorder %s2227_s26, 3 }
  0x11   : > { %s2331_s10 = scalar_select %p193_p7, %s2215_s23, %s195_s30  }
  0x12   : > { %s2712_s9 = scalar_select %p2325_p8, 1, 0 }
  0x13   : > { %p2333_p10 = pnand %p1648_p6, %p219_p9  ;;  %p2337_p11 = scmp.eq.s32.totalorder %s1646_s27, 0 }
  0x14   : > { %s2229_s13 = smov [#allocation7]   ;;  %s2230_s16 = smov [#allocation9]  }
  0x15   : > { %s2713_s11 = scalar_select %p2333_p10, 1, 0 }
  0x16   : > { %s2714_s12 = scalar_select %p2337_p11, 1, 0 }
  0x17   : > { %p1925_p12 = pneg %p2333_p10  ;;  %s231_s14 = sshll.u32 %s2229_s13, 4  ;;  %s232_s14 = int_to_ptr.vmem [resolvable:$true] %s231_s14 }
  0x18   : > { %s244_s17 = sshll.u32 %s2230_s16, 4  ;;  %s2057_s20 = scalar_lea.hbm %s2697_s1, 512  ;;  %s245_s17 = int_to_ptr.vmem [resolvable:$true] %s244_s17 }
  0x19   : > { %p2345_p13 = pnand %p2337_p11, %p1925_p12  ;;  %p2058_p1 = scmp.ne.s32.totalorder %s2697_s1, %s2057_s20 }
  0x1a   : > { %p2064_p6 = scmp.lt.u32.totalorder %s2057_s20, %s2697_s1 }
  0x1b   : > { %p2059_p2 = pneg %p2345_p13 }
  0x1d   : > { %p2060_p3 = pnand %p2059_p2, %p2058_p1 }
  0x1f   : > { %p2061_p5 = pneg %p2060_p3 }
  0x21   : > { %p2066_p7 = pnand %p2064_p6, %p2061_p5 }
  0x23   : > { %2069 = shalt.err (!%p2066_p7)
}
  0x24   : > { %s2070_s13 = scalar_lea.vmem %s232_s14, 512  ;;  %p2078_p8 = scmp.lt.s32.totalorder %s232_s14, %s232_s14 }
  0x25   : > { %p2071_p9 = scmp.ne.s32.totalorder %s232_s14, %s2070_s13  ;;  %p2079_p4 = scmp.lt.s32.totalorder %s2070_s13, %s2070_s13 }
  0x27   : > { %p2073_p12 = pnand %p2071_p9, %p2059_p2  ;;  %p2080_p11 = por %p2079_p4, %p2078_p8 }
  0x29   : > { %p2074_p0 = pneg %p2073_p12 }
  0x2b   : > { %p2081_p10 = pnand %p2080_p11, %p2074_p0 }
  0x2d   : > { %2084 = shalt.err (!%p2081_p10)
}
  0x2e   : > { %s2231_s16 = smov 128   ;;  %s2232_s18 = smov 8  }
  0x2f   : > { %1928 = dma.hbm_to_vmem [thread:$0]  (!%p2345_p13), %s2697_s1, 512, %s232_s14, [#allocation8], %s2231_s16, %s2231_s16, %s2232_s18  }
  0x30   : > { %s2085_s30 = scalar_lea.hbm %s2698_s2, 1024 }
  0x31   : > { %p2086_p4 = scmp.ne.s32.totalorder %s2698_s2, %s2085_s30  ;;  %p2092_p11 = scmp.lt.u32.totalorder %s2085_s30, %s2698_s2 }
  0x33   : > { %p2088_p8 = pnand %p2086_p4, %p2059_p2 }
  0x35   : > { %p2089_p10 = pneg %p2088_p8 }
  0x37   : > { %p2094_p0 = pnand %p2092_p11, %p2089_p10 }
  0x39   : > { %2097 = shalt.err (!%p2094_p0)
}
  0x3a   : > { %s2098_s14 = scalar_lea.vmem %s245_s17, 1024  ;;  %p2106_p7 = scmp.lt.s32.totalorder %s245_s17, %s245_s17 }
  0x3b   : > { %p2099_p3 = scmp.ne.s32.totalorder %s245_s17, %s2098_s14  ;;  %p2107_p9 = scmp.lt.s32.totalorder %s2098_s14, %s2098_s14 }
  0x3d   : > { %p2101_p5 = pnand %p2099_p3, %p2059_p2  ;;  %p2108_p12 = por %p2107_p9, %p2106_p7 }
  0x3f   : > { %p2102_p6 = pneg %p2101_p5 }
  0x41   : > { %p2109_p1 = pnand %p2108_p12, %p2102_p6 }
  0x43   : > { %2112 = shalt.err (!%p2109_p1)
}
  0x44   : > { %1931 = dma.hbm_to_vmem [thread:$0]  (!%p2345_p13), %s2698_s2, 1024, %s245_s17, [#allocation8], %s2231_s16, %s2231_s16, %s2232_s18  }
  0x45   : > { %p1943_p4 = scmp.eq.s32.totalorder %s2227_s26, 0  ;;  %s2233_s19 = smov [#allocation4]  }
  0x46   : > { %s283_s20 = sshll.u32 %s2233_s19, 4  ;;  %p2716_p2 = scmp.lt.s32.totalorder %s2227_s26, 2  ;;  %s284_s20 = int_to_ptr.vmem [resolvable:$true] %s283_s20 }
  0x47   : > { %s2113_s30 = scalar_lea.hbm %s2696_s0, 1024 }
  0x48   : > { %p2402_p8 = pnand %p1943_p4, %p2716_p2  ;;  %p2114_p1 = scmp.ne.s32.totalorder %s2696_s0, %s2113_s30 }
  0x49   : > { %p2120_p0 = scmp.lt.u32.totalorder %s2113_s30, %s2696_s0 }
  0x4a   : > { %p2115_p13 = pneg %p2402_p8 }
  0x4c   : > { %p2116_p10 = pnand %p2115_p13, %p2114_p1 }
  0x4e   : > { %p2117_p11 = pneg %p2116_p10 }
  0x50   : > { %p2122_p3 = pnand %p2120_p0, %p2117_p11 }
  0x52   : > { %2125 = shalt.err (!%p2122_p3)
}
  0x53   : > { %s2126_s25 = scalar_lea.vmem %s284_s20, 1024  ;;  %s2133_s29 = scalar_lea.vmem %s284_s20, 2048 }
  0x54   : > { %p2127_p5 = scmp.ne.s32.totalorder %s284_s20, %s2126_s25  ;;  %p2134_p9 = scmp.lt.s32.totalorder %s284_s20, %s284_s20 }
  0x55   : > { %p2135_p12 = scmp.lt.s32.totalorder %s2133_s29, %s2126_s25 }
  0x56   : > { %p2129_p6 = pnand %p2127_p5, %p2115_p13 }
  0x57   : > { %p2136_p4 = por %p2135_p12, %p2134_p9 }
  0x58   : > { %p2130_p7 = pneg %p2129_p6 }
  0x5a   : > { %p2137_p2 = pnand %p2136_p4, %p2130_p7 }
  0x5c   : > { %2140 = shalt.err (!%p2137_p2)
}
  0x5d   : > { %1935 = dma.hbm_to_vmem [thread:$0]  (!%p2402_p8), %s2696_s0, 1024, %s284_s20, [#allocation5], %s2231_s16, %s2231_s16, %s2232_s18  }
  0x5e   : > { %p2718_p1 = scmp.ne.s32.totalorder %s2713_s11, 0 }
  0x5f   : > { %p2719_p13 = scmp.ne.s32.totalorder (!%p2718_p1), %s2714_s12, 0 }
  0x60   : > { %295 = sbr.rel (%p2718_p1) target bundleno = 5678 (0x162e), region = 44 }
  0x67   : > { %2194 = dma.done.wait (%p2719_p13), [#allocation5], 1024  }
  0x68   : > { %2196 = vsyncadd (%p2719_p13), [#allocation5], 4294966272 }
  0x69   : > { %2198 = dma.done.wait (%p2719_p13), [#allocation8], 1536  }
  0x6a   : > { %2200 = vsyncadd (%p2719_p13), [#allocation8], 4294965760  ;;  %v2234_v0 = vmov 0.0|0.0   ;;  %s1658_s16 = sshll.u32 %s2219_s24, 4  ;;  %s1667_s11 = sshll.u32 %s2219_s24, 5  ;;  %vm354_vm0 = vcmask 261120  }
  0x6b   : > { %1863 = vmatprep.subr.bf16.mxu1 %v2234_v0  ;;  %vm2235_vm1 = vmmov 0   ;;  %v2236_v1 = vmov 0.0   ;;  %vm368_vm2 = vcmask 130048   ;;  %s357_s12 = scalar_lea.vmem [#allocation7], %s1658_s16  ;;  %s508_s18 = scalar_lea.vmem [#allocation9], %s1667_s11  ;;  %v360_v7 = vld [vmem:[#allocation4] sm:$0xff] }
  0x6c   : > { %1779 = vmatprep.mubr.msk.f32.mxu1 %vm2235_vm1, %v2236_v1  ;;  %355 = vst.msk [vmem:[#allocation2] sm:$0xff] %vm354_vm0, %v2236_v1  ;;  %v358_v2 = vld [vmem:[%s357_s12] sm:$0xff]  ;;  %v359_v3 = vld [vmem:[%s357_s12 + $0x8] sm:$0xff]  ;;  %1759 = vmatprep.mubr.msk.f32.mxu0 %vm368_vm2, %v360_v7  ;;  %v511_v9 = vld [vmem:[%s508_s18 + $0x10] sm:$0xff]  ;;  %s517_s15 = scalar_lea.vmem %s2701_s5, %s2219_s24  ;;  %s515_s13 = scalar_lea.vmem %s2700_s4, %s2219_s24  ;;  %vm498_vm3 = vcmask 785408  }
  0x6d   : > { %v509_v4 = vld [vmem:[%s508_s18] sm:$0xff]  ;;  %v1859_v5 = vpack.c.bf16 %v359_v3, %v358_v2  ;;  %v510_v6 = vld [vmem:[%s508_s18 + $0x8] sm:$0xff]  ;;  %v512_v10 = vld [vmem:[%s508_s18 + $0x18] sm:$0xff]  ;;  %s2237_s17 = smov 64   ;;  %s521_s14 = smul.u32 56, %s2219_s24 }
  0x6e   : > { %v2442_v8 = vpack.c.bf16 %v510_v6, %v509_v4  ;;  %v361_v11 = vld [vmem:[#allocation4 + $0x8] sm:$0xff]  ;;  %v2454_v12 = vpack.c.bf16 %v512_v10, %v511_v9  ;;  %v362_v13 = vld [vmem:[#allocation4 + $0x10] sm:$0xff]  ;;  %v1672_v14 = vld [vmem:[%s517_s15] ss:$0 sm:$0xff]  ;;  %s513_s28 = scalar_lea.vmem %s2699_s3, %s2219_s24  ;;  %s2238_s16 = smov 32  }
  0x6f   : > { %1860 = vmatprep.subr.bf16.mxu0 %v1859_v5  ;;  %v1671_v15 = vld [vmem:[%s515_s13] ss:$0 sm:$0xff]  ;;  %626 = vrot.lane.b32.xlu0 %v1672_v14, %s2237_s17  ;;  %v364_v18 = vld [vmem:[#allocation4 + $0x20] sm:$0xff]  ;;  %v365_v19 = vld [vmem:[#allocation4 + $0x28] sm:$0xff]  ;;  %s522_s25 = scalar_lea.vmem [#allocation3], %s521_s14  ;;  %s2239_s11 = smov 96  }
  0x70   : > { %1865 = vmatpush3.bf16.msra.mxu1 %v2442_v8  ;;  %1862 = vmatpush3.bf16.msra.mxu0 %v1859_v5  ;;  %v363_v17 = vld [vmem:[#allocation4 + $0x18] sm:$0xff]  ;;  %v366_v20 = vld [vmem:[#allocation4 + $0x30] sm:$0xff]  ;;  %s335_s12 = sand.u32 1, %s2211_s22   ;;  %s660_s15 = smul.u32 6, %s2219_s24 }
  0x71   : > { %1866 = vmatprep.subr.bf16.mxu1 %v2234_v0  ;;  %1875 = vmatprep.subr.bf16.mxu0 %v2234_v0  ;;  %v367_v21 = vld [vmem:[#allocation4 + $0x38] sm:$0xff]  ;;  %s1657_s18 = sshll.u32 %s335_s12, 6  ;;  %s2530_s30 = ssub.s32 1, %s2219_s24 }
  0x72   : > { %617 = vrot.lane.b32.xlu1 %v1671_v15, %s2237_s17  ;;  %v2501_v36 = vld [vmem:[%s513_s28] ss:$0 sm:$0xff]  ;;  %s2513_s20 = scalar_lea.vmem [#allocation10], %s1657_s18  ;;  %s661_s8 = sadd.s32 %s660_s15, %s2530_s30 }
  0x73   : > { %1760 = vmatmul.mubr.msk.f32.vlgmr.msra.gmra.mrb[0].mxu0 %vm368_vm2, %v361_v11  ;;  %v519_v16 = vld [vmem:[#allocation2] sm:$0xff]  ;;  %s657_s27 = scalar_lea.vmem %s2513_s20, %s521_s14 [#allocation10]  ;;  %s1674_s13 = sshll.u32 %s661_s8, 3 }
  0x74   : > { %1868 = vmatpush3.bf16.msra.mxu1 %v2454_v12  ;;  %1762 = vmatprep.mubr.msk.f32.mxu0 %vm368_vm2, %v362_v13  ;;  %s663_s14 = scalar_lea.vmem [#allocation3], %s1674_s13  ;;  %s773_s29 = smul.u32 5, %s2219_s24 }
  0x75   : > { %1869 = vmatprep.subr.bf16.mxu1 %v2234_v0  ;;  %1877 = vmatpush3.bf16.msra.mxu0 %v2442_v8  ;;  %s1677_s19 = sshll.u32 %s2530_s30, 1  ;;  %s885_s15 = smul.u32 3, %s2530_s30 }
  0x76   : > { %1878 = vmatprep.subr.bf16.mxu0 %v2234_v0  ;;  %s774_s28 = sadd.s32 %s1677_s19, %s773_s29  ;;  %s1681_s8 = sshll.u32 %s2219_s24, 2 }
  0x77   : > { %1780 = vmatmul.mubr.msk.f32.vlgmr.msra.gmra.mrb[0].mxu1 %vm354_vm0, %v519_v16  ;;  %1763 = vmatmul.mubr.msk.f32.gmra.mrb[2].mxu0 %vm368_vm2, %v363_v17  ;;  %s999_s19 = smul.u32 3, %s2219_s24  ;;  %p2720_p10 = scmp.ne.s32.totalorder %s2711_s7, 0 }
  0x78   : > { %1765 = vmatprep.mubr.msk.f32.mxu0 %vm368_vm2, %v364_v18  ;;  %1871 = vmatpush3.bf16.msra.mxu1 %v2442_v8 }
  0x79   : > { %1872 = vmatprep.subr.bf16.mxu1 %v2234_v0  ;;  %1790 = vmatprep.mubr.msk.f32.mxu1 %vm2235_vm1, %v2236_v1 }
  0x7a   : > { %1880 = vmatpush3.bf16.msra.mxu0 %v2454_v12 }
  0x7b   : > { %1766 = vmatmul.mubr.msk.f32.gmra.mrb[4].mxu0 %vm368_vm2, %v365_v19  ;;  %1887 = vmatprep.subr.bf16.mxu0 %v2234_v0 }
  0x7c   : > { %1768 = vmatprep.mubr.msk.f32.mxu0 %vm368_vm2, %v366_v20  ;;  %1874 = vmatpush3.bf16.msra.mxu1 %v2454_v12 }
  0x7d   : > { %1881 = vmatprep.subr.bf16.mxu1 %v2234_v0 }
  0x7f   : > { %1769 = vmatmul.mubr.msk.f32.gmra.mrb[6].mxu0 %vm368_vm2, %v367_v21 }
  0x80   : > { %1801 = vmatprep.mubr.msk.f32.mxu0 %vm2235_vm1, %v2236_v1 }
  0xe1   : > { %v2483_v24 = vpop.permute.xlu0 %626 }
  0xe4   : > { %v2505_v44 = vpop.permute.xlu1 %617 }
 0x146   : > { %v1761_v22 = vpop.f32.mrb[0].mxu0 }
 0x147   : > { %500 = vst.msk [vmem:[#allocation3 + $0x8] sm:$0xff] %vm498_vm3, %v1761_v22  ;;  %v459_v23 = vpop.f32.mrb[1].mxu0 }
 0x148   : > { %499 = vst.msk [vmem:[#allocation3] sm:$0xff] %vm498_vm3, %v459_v23 }
 0x14a   : > { %v594_v25 = vpop.f32.mrb[0].mxu1  ;;  %v1764_v26 = vpop.f32.mrb[2].mxu0 }
 0x14b   : > { %v629_v27 = vadd.f32 %v2483_v24, %v594_v25  ;;  %v1781_v28 = vpop.f32.mrb[1].mxu1  ;;  %502 = vst.msk [vmem:[#allocation3 + $0x18] sm:$0xff] %vm498_vm3, %v1764_v26  ;;  %v469_v29 = vpop.f32.mrb[3].mxu0 }
 0x14c   : > { %501 = vst.msk [vmem:[#allocation3 + $0x10] sm:$0xff] %vm498_vm3, %v469_v29 }
 0x14d   : > { %631 = vrot.lane.b32.xlu0 %v629_v27, %s2237_s17 }
 0x14e   : > { %v1767_v30 = vpop.f32.mrb[4].mxu0 }
 0x14f   : > { %504 = vst.msk [vmem:[#allocation3 + $0x28] sm:$0xff] %vm498_vm3, %v1767_v30  ;;  %v479_v31 = vpop.f32.mrb[5].mxu0 }
 0x150   : > { %503 = vst.msk [vmem:[#allocation3 + $0x20] sm:$0xff] %vm498_vm3, %v479_v31 }
 0x152   : > { %v1770_v32 = vpop.f32.mrb[6].mxu0 }
 0x153   : > { %506 = vst.msk [vmem:[#allocation3 + $0x38] sm:$0xff] %vm498_vm3, %v1770_v32  ;;  %v489_v33 = vpop.f32.mrb[7].mxu0 }
 0x154   : > { %505 = vst.msk [vmem:[#allocation3 + $0x30] sm:$0xff] %vm498_vm3, %v489_v33 }
 0x15b   : > { %v523_v34 = vld [vmem:[%s522_s25] sm:$0xff]  ;;  %s770_s25 = scalar_lea.vmem %s2513_s20, %s1674_s13 [#allocation10]  ;;  %s887_s13 = sadd.s32 %s1681_s8, %s885_s15 }
 0x15c   : > { %v598_v35 = vadd.f32 %v594_v25, %v523_v34  ;;  %v620_v45 = vadd.f32 %v2505_v44, %v523_v34  ;;  %v664_v59 = vld [vmem:[%s663_s14] sm:$0xff]  ;;  %s1682_s14 = sshll.u32 %s887_s13, 3  ;;  %s1111_s8 = smul.u32 5, %s2530_s30 }
 0x15d   : > { %v745_v6 = vadd.f32 %v664_v59, %v2505_v44  ;;  %s996_s29 = scalar_lea.vmem %s2513_s20, %s1682_s14 [#allocation10]  ;;  %s1689_s13 = sshll.u32 %s2219_s24, 1 }
 0x15e   : > { %v605_v37 = vadd.f32 %v2501_v36, %v598_v35 }
 0x160   : > { %v1670_v38 = vmul.f32 -1.442695, %v605_v37 }
 0x162   : > { %2009 = vpow2.f32 %v1670_v38 }
 0x16c   : > { %v2010_v39 = vpop.eup %2009 }
 0x16d   : > { %v609_v40 = vadd.f32 1.0, %v2010_v39 }
 0x16f   : > { %2011 = vrcp.f32 %v609_v40 }
 0x179   : > { %v2012_v41 = vpop.eup %2011 }
 0x17a   : > { %v641_v50 = vsub.f32 1.0, %v2012_v41 }
 0x1bf   : > { %v632_v42 = vpop.permute.xlu0 %631 }
 0x1c0   : > { %v634_v43 = vmul.f32 %v2012_v41, %v632_v42 }
 0x1c2   : > { %636 = vrot.lane.b32.xlu1 %v634_v43, %s2237_s17 }
 0x1c6   : > { %647 = vrot.lane.b32.xlu1 %v519_v16, %s2238_s16  ;;  %s1678_s16 = sshll.u32 %s774_s28, 3  ;;  %s1685_s28 = sshll.u32 %s2530_s30, 2 }
 0x1c7   : > { %s776_s18 = scalar_lea.vmem [#allocation3], %s1678_s16 }
 0x1c8   : > { %v777_v21 = vld [vmem:[%s776_s18] sm:$0xff] }
 0x1c9   : > { %v858_v31 = vadd.f32 %v777_v21, %v2505_v44 }
 0x234   : > { %v637_v46 = vpop.permute.xlu1 %636 }
 0x235   : > { %v639_v47 = vadd.f32 %v637_v46, %v620_v45 }
 0x237   : > { %2013 = vtanh.f32 %v639_v47 }
 0x238   : > { %v648_v49 = vpop.permute.xlu1 %647 }
 0x239   : > { %v650_v52 = vmul.f32 %v2012_v41, %v648_v49 }
 0x241   : > { %v2014_v48 = vpop.eup %2013 }
 0x242   : > { %643 = vrot.lane.b32.xlu0 %v2014_v48, %s2239_s11 }
 0x2b4   : > { %v644_v51 = vpop.permute.xlu0 %643 }
 0x2b5   : > { %v646_v53 = vmul.f32 %v644_v51, %v641_v50 }
 0x2b7   : > { %v651_v54 = vadd.f32 %v650_v52, %v646_v53 }
 0x2b9   : > { %653 = vrot.lane.b32.xlu0 %v651_v54, %s2239_s11 }
 0x32b   : > { %v654_v55 = vpop.permute.xlu0 %653 }
 0x32c   : > { %658 = vst.msk [vmem:[%s657_s27] sm:$0xff] %vm354_vm0, %v654_v55  ;;  %1791 = vmatmul.mubr.msk.f32.vlgmr.msra.gmra.mrb[2].mxu1 %vm354_vm0, %v654_v55  ;;  %s883_s27 = scalar_lea.vmem %s2513_s20, %s1678_s16 [#allocation10]  ;;  %s1000_s16 = sadd.s32 %s1685_s28, %s999_s19 }
 0x32d   : > { %1883 = vmatpush3.bf16.msra.mxu1 %v2442_v8  ;;  %1812 = vmatprep.mubr.msk.f32.mxu1 %vm2235_vm1, %v2236_v1  ;;  %s1686_s18 = sshll.u32 %s1000_s16, 3  ;;  %s1224_s28 = smul.u32 6, %s2530_s30 }
 0x32e   : > { %1884 = vmatprep.subr.bf16.mxu1 %v2234_v0  ;;  %s1109_s15 = scalar_lea.vmem %s2513_s20, %s1686_s18 [#allocation10] }
 0x32f   : > { %s1225_s16 = sadd.s32 %s2219_s24, %s1224_s28 }
 0x331   : > { %1886 = vmatpush3.bf16.msra.mxu1 %v2454_v12 }
 0x332   : > { %1893 = vmatprep.subr.bf16.mxu1 %v2234_v0 }
 0x3ff   : > { %v733_v56 = vpop.f32.mrb[2].mxu1 }
 0x400   : > { %v746_v57 = vadd.f32 %v733_v56, %v2483_v24  ;;  %v1792_v58 = vpop.f32.mrb[3].mxu1  ;;  %v737_v60 = vadd.f32 %v733_v56, %v664_v59 }
 0x402   : > { %748 = vrot.lane.b32.xlu1 %v746_v57, %s2237_s17  ;;  %v738_v61 = vadd.f32 %v2501_v36, %v737_v60 }
 0x404   : > { %v1676_v62 = vmul.f32 -1.442695, %v738_v61 }
 0x406   : > { %2015 = vpow2.f32 %v1676_v62 }
 0x410   : > { %v2016_v63 = vpop.eup %2015 }
 0x411   : > { %v742_v2 = vadd.f32 1.0, %v2016_v63 }
 0x413   : > { %2017 = vrcp.f32 %v742_v2 }
 0x41d   : > { %v2018_v3 = vpop.eup %2017 }
 0x41e   : > { %v758_v11 = vsub.f32 1.0, %v2018_v3  ;;  %v764_v14 = vmul.f32 %v2018_v3, %v651_v54 }
 0x474   : > { %v749_v4 = vpop.permute.xlu1 %748 }
 0x475   : > { %v751_v5 = vmul.f32 %v2018_v3, %v749_v4 }
 0x477   : > { %753 = vrot.lane.b32.xlu0 %v751_v5, %s2237_s17 }
 0x4e9   : > { %v754_v7 = vpop.permute.xlu0 %753 }
 0x4ea   : > { %v756_v9 = vadd.f32 %v754_v7, %v745_v6 }
 0x4ec   : > { %2019 = vtanh.f32 %v756_v9 }
 0x4f6   : > { %v2020_v10 = vpop.eup %2019 }
 0x4f7   : > { %760 = vrot.lane.b32.xlu1 %v2020_v10, %s2239_s11 }
 0x569   : > { %v761_v13 = vpop.permute.xlu1 %760 }
 0x56a   : > { %v763_v15 = vmul.f32 %v761_v13, %v758_v11 }
 0x56c   : > { %v765_v16 = vadd.f32 %v764_v14, %v763_v15 }
 0x56e   : > { %767 = vrot.lane.b32.xlu0 %v765_v16, %s2239_s11 }
 0x5e0   : > { %v768_v17 = vpop.permute.xlu0 %767 }
 0x5e1   : > { %771 = vst.msk [vmem:[%s770_s25] sm:$0xff] %vm354_vm0, %v768_v17  ;;  %1802 = vmatmul.mubr.msk.f32.vlgmr.msra.gmra.mrb[8].mxu0 %vm354_vm0, %v768_v17  ;;  %s889_s25 = scalar_lea.vmem [#allocation3], %s1682_s14  ;;  %s1113_s14 = sadd.s32 %s1689_s13, %s1111_s8 }
 0x5e2   : > { %1889 = vmatpush3.bf16.msra.mxu0 %v2442_v8  ;;  %1823 = vmatprep.mubr.msk.f32.mxu0 %vm2235_vm1, %v2236_v1  ;;  %v890_v46 = vld [vmem:[%s889_s25] sm:$0xff]  ;;  %s1690_s25 = sshll.u32 %s1113_s14, 3  ;;  %s1337_s8 = smul.u32 56, %s2530_s30 }
 0x5e3   : > { %1890 = vmatprep.subr.bf16.mxu0 %v2234_v0  ;;  %v971_v55 = vadd.f32 %v890_v46, %v2505_v44  ;;  %s1222_s19 = scalar_lea.vmem %s2513_s20, %s1690_s25 [#allocation10]  ;;  %s1704_s14 = sshll.u32 %s2219_s24, 10 }
 0x5e4   : > { %s1338_s13 = scalar_lea.vmem [#allocation3], %s1337_s8  ;;  %s2643_s28 = scalar_lea.hbm %s2702_s6, %s1704_s14 }
 0x5e5   : > { %s2240_s30 = smov [#allocation10]  }
 0x5e6   : > { %1892 = vmatpush3.bf16.msra.mxu0 %v2454_v12 }
 0x5e7   : > { %1899 = vmatprep.subr.bf16.mxu0 %v2234_v0 }
 0x6b4   : > { %v846_v18 = vpop.f32.mrb[8].mxu0 }
 0x6b5   : > { %v859_v19 = vadd.f32 %v846_v18, %v2483_v24  ;;  %v1803_v20 = vpop.f32.mrb[9].mxu0  ;;  %v850_v22 = vadd.f32 %v846_v18, %v777_v21 }
 0x6b7   : > { %861 = vrot.lane.b32.xlu1 %v859_v19, %s2237_s17  ;;  %v851_v23 = vadd.f32 %v2501_v36, %v850_v22 }
 0x6b9   : > { %v1680_v25 = vmul.f32 -1.442695, %v851_v23 }
 0x6bb   : > { %2021 = vpow2.f32 %v1680_v25 }
 0x6c5   : > { %v2022_v26 = vpop.eup %2021 }
 0x6c6   : > { %v855_v27 = vadd.f32 1.0, %v2022_v26 }
 0x6c8   : > { %2023 = vrcp.f32 %v855_v27 }
 0x6d2   : > { %v2024_v28 = vpop.eup %2023 }
 0x6d3   : > { %v871_v35 = vsub.f32 1.0, %v2024_v28  ;;  %v877_v38 = vmul.f32 %v2024_v28, %v765_v16 }
 0x729   : > { %v862_v29 = vpop.permute.xlu1 %861 }
 0x72a   : > { %v864_v30 = vmul.f32 %v2024_v28, %v862_v29 }
 0x72c   : > { %866 = vrot.lane.b32.xlu0 %v864_v30, %s2237_s17 }
 0x79e   : > { %v867_v32 = vpop.permute.xlu0 %866 }
 0x79f   : > { %v869_v33 = vadd.f32 %v867_v32, %v858_v31 }
 0x7a1   : > { %2025 = vtanh.f32 %v869_v33 }
 0x7ab   : > { %v2026_v34 = vpop.eup %2025 }
 0x7ac   : > { %873 = vrot.lane.b32.xlu1 %v2026_v34, %s2239_s11 }
 0x81e   : > { %v874_v37 = vpop.permute.xlu1 %873 }
 0x81f   : > { %v876_v39 = vmul.f32 %v874_v37, %v871_v35 }
 0x821   : > { %v878_v40 = vadd.f32 %v877_v38, %v876_v39 }
 0x823   : > { %880 = vrot.lane.b32.xlu0 %v878_v40, %s2239_s11 }
 0x895   : > { %v881_v41 = vpop.permute.xlu0 %880 }
 0x896   : > { %884 = vst.msk [vmem:[%s883_s27] sm:$0xff] %vm354_vm0, %v881_v41  ;;  %1813 = vmatmul.mubr.msk.f32.vlgmr.msra.gmra.mrb[4].mxu1 %vm354_vm0, %v881_v41  ;;  %s1002_s27 = scalar_lea.vmem [#allocation3], %s1686_s18  ;;  %s1693_s18 = sshll.u32 %s1225_s16, 3 }
 0x897   : > { %1895 = vmatpush3.bf16.msra.mxu1 %v2442_v8  ;;  %1834 = vmatprep.mubr.msk.f32.mxu1 %vm2235_vm1, %v2236_v1  ;;  %v1003_v6 = vld [vmem:[%s1002_s27] sm:$0xff]  ;;  %s1227_s27 = scalar_lea.vmem [#allocation3], %s1693_s18 }
 0x898   : > { %1896 = vmatprep.subr.bf16.mxu1 %v2234_v0  ;;  %v1084_v17 = vadd.f32 %v1003_v6, %v2505_v44 }
 0x89b   : > { %1898 = vmatpush3.bf16.msra.mxu1 %v2454_v12 }
 0x89c   : > { %1905 = vmatprep.subr.bf16.mxu1 %v2234_v0 }
 0x969   : > { %v959_v42 = vpop.f32.mrb[4].mxu1 }
 0x96a   : > { %v972_v43 = vadd.f32 %v959_v42, %v2483_v24  ;;  %v1814_v45 = vpop.f32.mrb[5].mxu1  ;;  %v963_v47 = vadd.f32 %v959_v42, %v890_v46 }
 0x96c   : > { %974 = vrot.lane.b32.xlu1 %v972_v43, %s2237_s17  ;;  %v964_v48 = vadd.f32 %v2501_v36, %v963_v47 }
 0x96e   : > { %v1684_v49 = vmul.f32 -1.442695, %v964_v48 }
 0x970   : > { %2027 = vpow2.f32 %v1684_v49 }
 0x97a   : > { %v2028_v50 = vpop.eup %2027 }
 0x97b   : > { %v968_v51 = vadd.f32 1.0, %v2028_v50 }
 0x97d   : > { %2029 = vrcp.f32 %v968_v51  ;;  %v1228_v51 = vld [vmem:[%s1227_s27] sm:$0xff] }
 0x987   : > { %v2030_v52 = vpop.eup %2029 }
 0x988   : > { %v984_v59 = vsub.f32 1.0, %v2030_v52  ;;  %v990_v61 = vmul.f32 %v2030_v52, %v878_v40 }
 0x9de   : > { %v975_v53 = vpop.permute.xlu1 %974 }
 0x9df   : > { %v977_v54 = vmul.f32 %v2030_v52, %v975_v53 }
 0x9e1   : > { %979 = vrot.lane.b32.xlu0 %v977_v54, %s2237_s17 }
 0xa53   : > { %v980_v56 = vpop.permute.xlu0 %979 }
 0xa54   : > { %v982_v57 = vadd.f32 %v980_v56, %v971_v55 }
 0xa56   : > { %2031 = vtanh.f32 %v982_v57 }
 0xa60   : > { %v2032_v58 = vpop.eup %2031 }
 0xa61   : > { %986 = vrot.lane.b32.xlu1 %v2032_v58, %s2239_s11 }
 0xad3   : > { %v987_v60 = vpop.permute.xlu1 %986 }
 0xad4   : > { %v989_v62 = vmul.f32 %v987_v60, %v984_v59  ;;  %v1309_v60 = vadd.f32 %v1228_v51, %v2505_v44 }
 0xad6   : > { %v991_v63 = vadd.f32 %v990_v61, %v989_v62 }
 0xad8   : > { %993 = vrot.lane.b32.xlu0 %v991_v63, %s2239_s11 }
 0xb4a   : > { %v994_v2 = vpop.permute.xlu0 %993 }
 0xb4b   : > { %997 = vst.msk [vmem:[%s996_s29] sm:$0xff] %vm354_vm0, %v994_v2  ;;  %1824 = vmatmul.mubr.msk.f32.vlgmr.msra.gmra.mrb[10].mxu0 %vm354_vm0, %v994_v2  ;;  %s1115_s29 = scalar_lea.vmem [#allocation3], %s1690_s25  ;;  %s1446_s25 = scalar_lea.vmem %s2513_s20, %s1337_s8 [#allocation10] }
 0xb4c   : > { %1901 = vmatpush3.bf16.msra.mxu0 %v2442_v8  ;;  %1845 = vmatprep.mubr.msk.f32.mxu0 %vm2235_vm1, %v2236_v1  ;;  %v1116_v31 = vld [vmem:[%s1115_s29] sm:$0xff] }
 0xb4d   : > { %1902 = vmatprep.subr.bf16.mxu0 %v2234_v0  ;;  %v1197_v37 = vadd.f32 %v1116_v31, %v2505_v44 }
 0xb50   : > { %1904 = vmatpush3.bf16.msra.mxu0 %v2454_v12 }
 0xc1e   : > { %v1072_v3 = vpop.f32.mrb[10].mxu0 }
 0xc1f   : > { %v1085_v4 = vadd.f32 %v1072_v3, %v2483_v24  ;;  %v1825_v5 = vpop.f32.mrb[11].mxu0  ;;  %v1076_v7 = vadd.f32 %v1072_v3, %v1003_v6 }
 0xc21   : > { %1087 = vrot.lane.b32.xlu1 %v1085_v4, %s2237_s17  ;;  %v1077_v9 = vadd.f32 %v2501_v36, %v1076_v7 }
 0xc23   : > { %v1688_v10 = vmul.f32 -1.442695, %v1077_v9 }
 0xc25   : > { %2033 = vpow2.f32 %v1688_v10 }
 0xc2f   : > { %v2034_v11 = vpop.eup %2033 }
 0xc30   : > { %v1081_v13 = vadd.f32 1.0, %v2034_v11 }
 0xc32   : > { %2035 = vrcp.f32 %v1081_v13  ;;  %v1339_v13 = vld [vmem:[%s1338_s13] sm:$0xff] }
 0xc3c   : > { %v2036_v14 = vpop.eup %2035 }
 0xc3d   : > { %v1097_v21 = vsub.f32 1.0, %v2036_v14  ;;  %v1103_v23 = vmul.f32 %v2036_v14, %v991_v63 }
 0xc93   : > { %v1088_v15 = vpop.permute.xlu1 %1087 }
 0xc94   : > { %v1090_v16 = vmul.f32 %v2036_v14, %v1088_v15 }
 0xc96   : > { %1092 = vrot.lane.b32.xlu0 %v1090_v16, %s2237_s17 }
 0xd08   : > { %v1093_v18 = vpop.permute.xlu0 %1092 }
 0xd09   : > { %v1095_v19 = vadd.f32 %v1093_v18, %v1084_v17 }
 0xd0b   : > { %2037 = vtanh.f32 %v1095_v19 }
 0xd15   : > { %v2038_v20 = vpop.eup %2037 }
 0xd16   : > { %1099 = vrot.lane.b32.xlu1 %v2038_v20, %s2239_s11 }
 0xd88   : > { %v1100_v22 = vpop.permute.xlu1 %1099 }
 0xd89   : > { %v1102_v25 = vmul.f32 %v1100_v22, %v1097_v21  ;;  %v1420_v21 = vadd.f32 %v1339_v13, %v2505_v44 }
 0xd8b   : > { %v1104_v26 = vadd.f32 %v1103_v23, %v1102_v25 }
 0xd8d   : > { %1106 = vrot.lane.b32.xlu0 %v1104_v26, %s2239_s11 }
 0xdff   : > { %v1107_v27 = vpop.permute.xlu0 %1106 }
 0xe00   : > { %1110 = vst.msk [vmem:[%s1109_s15] sm:$0xff] %vm354_vm0, %v1107_v27  ;;  %1835 = vmatmul.mubr.msk.f32.vlgmr.msra.gmra.mrb[6].mxu1 %vm354_vm0, %v1107_v27  ;;  %s1334_s15 = scalar_lea.vmem %s2513_s20, %s1693_s18 [#allocation10] }
 0xe01   : > { %1907 = vmatpush3.bf16.msra.mxu1 %v2442_v8  ;;  %1856 = vmatprep.mubr.msk.f32.mxu1 %vm2235_vm1, %v2236_v1 }
 0xe02   : > { %1908 = vmatprep.subr.bf16.mxu1 %v2234_v0 }
 0xe05   : > { %1910 = vmatpush3.bf16.msra.mxu1 %v2454_v12 }
 0xed3   : > { %v1185_v28 = vpop.f32.mrb[6].mxu1 }
 0xed4   : > { %v1198_v29 = vadd.f32 %v1185_v28, %v2483_v24  ;;  %v1836_v30 = vpop.f32.mrb[7].mxu1  ;;  %v1189_v8 = vadd.f32 %v1185_v28, %v1116_v31 }
 0xed6   : > { %1200 = vrot.lane.b32.xlu1 %v1198_v29, %s2237_s17  ;;  %v1190_v32 = vadd.f32 %v2501_v36, %v1189_v8 }
 0xed8   : > { %v1692_v1 = vmul.f32 -1.442695, %v1190_v32 }
 0xeda   : > { %2039 = vpow2.f32 %v1692_v1 }
 0xee4   : > { %v2040_v0 = vpop.eup %2039 }
 0xee5   : > { %v1194_v33 = vadd.f32 1.0, %v2040_v0 }
 0xee7   : > { %2041 = vrcp.f32 %v1194_v33 }
 0xef1   : > { %v2042_v12 = vpop.eup %2041 }
 0xef2   : > { %v1210_v41 = vsub.f32 1.0, %v2042_v12  ;;  %v1216_v43 = vmul.f32 %v2042_v12, %v1104_v26 }
 0xf48   : > { %v1201_v34 = vpop.permute.xlu1 %1200 }
 0xf49   : > { %v1203_v35 = vmul.f32 %v2042_v12, %v1201_v34 }
 0xf4b   : > { %1205 = vrot.lane.b32.xlu0 %v1203_v35, %s2237_s17 }
 0xfbd   : > { %v1206_v38 = vpop.permute.xlu0 %1205 }
 0xfbe   : > { %v1208_v39 = vadd.f32 %v1206_v38, %v1197_v37 }
 0xfc0   : > { %2043 = vtanh.f32 %v1208_v39 }
 0xfca   : > { %v2044_v40 = vpop.eup %2043 }
 0xfcb   : > { %1212 = vrot.lane.b32.xlu1 %v2044_v40, %s2239_s11 }
0x103d   : > { %v1213_v42 = vpop.permute.xlu1 %1212 }
0x103e   : > { %v1215_v45 = vmul.f32 %v1213_v42, %v1210_v41 }
0x1040   : > { %v1217_v46 = vadd.f32 %v1216_v43, %v1215_v45 }
0x1042   : > { %1219 = vrot.lane.b32.xlu0 %v1217_v46, %s2239_s11 }
0x10b4   : > { %v1220_v47 = vpop.permute.xlu0 %1219 }
0x10b5   : > { %1223 = vst.msk [vmem:[%s1222_s19] sm:$0xff] %vm354_vm0, %v1220_v47  ;;  %1846 = vmatmul.mubr.msk.f32.vlgmr.msra.gmra.mrb[12].mxu0 %vm354_vm0, %v1220_v47 }
0x1188   : > { %v1297_v48 = vpop.f32.mrb[12].mxu0 }
0x1189   : > { %v1310_v49 = vadd.f32 %v1297_v48, %v2483_v24  ;;  %v1847_v50 = vpop.f32.mrb[13].mxu0  ;;  %v1301_v52 = vadd.f32 %v1297_v48, %v1228_v51 }
0x118b   : > { %1312 = vrot.lane.b32.xlu1 %v1310_v49, %s2237_s17  ;;  %v1302_v53 = vadd.f32 %v2501_v36, %v1301_v52 }
0x118d   : > { %v1695_v54 = vmul.f32 -1.442695, %v1302_v53 }
0x118f   : > { %2045 = vpow2.f32 %v1695_v54 }
0x1199   : > { %v2046_v55 = vpop.eup %2045 }
0x119a   : > { %v1306_v56 = vadd.f32 1.0, %v2046_v55 }
0x119c   : > { %2047 = vrcp.f32 %v1306_v56 }
0x11a6   : > { %v2048_v57 = vpop.eup %2047 }
0x11a7   : > { %v1322_v2 = vsub.f32 1.0, %v2048_v57  ;;  %v1328_v4 = vmul.f32 %v2048_v57, %v1217_v46 }
0x11fd   : > { %v1313_v58 = vpop.permute.xlu1 %1312 }
0x11fe   : > { %v1315_v59 = vmul.f32 %v2048_v57, %v1313_v58 }
0x1200   : > { %1317 = vrot.lane.b32.xlu0 %v1315_v59, %s2237_s17 }
0x1272   : > { %v1318_v61 = vpop.permute.xlu0 %1317 }
0x1273   : > { %v1320_v62 = vadd.f32 %v1318_v61, %v1309_v60 }
0x1275   : > { %2049 = vtanh.f32 %v1320_v62 }
0x127f   : > { %v2050_v63 = vpop.eup %2049 }
0x1280   : > { %1324 = vrot.lane.b32.xlu1 %v2050_v63, %s2239_s11 }
0x12f2   : > { %v1325_v3 = vpop.permute.xlu1 %1324 }
0x12f3   : > { %v1327_v5 = vmul.f32 %v1325_v3, %v1322_v2 }
0x12f5   : > { %v1329_v6 = vadd.f32 %v1328_v4, %v1327_v5 }
0x12f7   : > { %1331 = vrot.lane.b32.xlu0 %v1329_v6, %s2239_s11 }
0x1369   : > { %v1332_v7 = vpop.permute.xlu0 %1331 }
0x136a   : > { %1335 = vst.msk [vmem:[%s1334_s15] sm:$0xff] %vm354_vm0, %v1332_v7  ;;  %1857 = vmatmul.mubr.msk.f32.vlgmr.msra.gmra.mrb[8].mxu1 %vm354_vm0, %v1332_v7 }
0x143d   : > { %v1408_v9 = vpop.f32.mrb[8].mxu1 }
0x143e   : > { %v1421_v10 = vadd.f32 %v1408_v9, %v2483_v24  ;;  %v1858_v11 = vpop.f32.mrb[9].mxu1  ;;  %v1412_v14 = vadd.f32 %v1408_v9, %v1339_v13 }
0x1440   : > { %1423 = vrot.lane.b32.xlu1 %v1421_v10, %s2237_s17  ;;  %v1413_v15 = vadd.f32 %v2501_v36, %v1412_v14 }
0x1442   : > { %v1697_v16 = vmul.f32 -1.442695, %v1413_v15 }
0x1444   : > { %2051 = vpow2.f32 %v1697_v16 }
0x144e   : > { %v2052_v17 = vpop.eup %2051 }
0x144f   : > { %v1417_v18 = vadd.f32 1.0, %v2052_v17 }
0x1451   : > { %2053 = vrcp.f32 %v1417_v18 }
0x145b   : > { %v2054_v19 = vpop.eup %2053 }
0x145c   : > { %v1433_v25 = vsub.f32 1.0, %v2054_v19  ;;  %v1439_v27 = vmul.f32 %v2054_v19, %v1329_v6 }
0x14b2   : > { %v1424_v20 = vpop.permute.xlu1 %1423 }
0x14b3   : > { %v1426_v24 = vmul.f32 %v2054_v19, %v1424_v20 }
0x14b5   : > { %1428 = vrot.lane.b32.xlu0 %v1426_v24, %s2237_s17  ;;  %s1470_s17 = sshll.u32 %s2513_s20, 4  ;;  %s2145_s20 = sshll.u32 %s2240_s30, 4  ;;  %s2635_s17 = int_to_ptr.vmem [resolvable:$true] %s1470_s17  ;;  %s2146_s20 = int_to_ptr.vmem [resolvable:$false] %s2145_s20 }
0x14b6   : > { %s2141_s24 = scalar_lea.vmem %s2635_s17, 1024  ;;  %s2147_s16 = scalar_lea.vmem %s2146_s20, 2048 }
0x14b7   : > { %p2142_p8 = scmp.ne.s32.totalorder %s2635_s17, %s2141_s24  ;;  %p2148_p3 = scmp.lt.s32.totalorder %s2635_s17, %s2146_s20 }
0x14b8   : > { %p2149_p5 = scmp.lt.s32.totalorder %s2147_s16, %s2141_s24 }
0x14b9   : > { %p2143_p11 = pnand %p2142_p8, %p2720_p10 }
0x14ba   : > { %p2150_p6 = por %p2149_p5, %p2148_p3 }
0x14bb   : > { %p2144_p0 = pneg %p2143_p11 }
0x14bd   : > { %p2151_p7 = pnand %p2150_p6, %p2144_p0 }
0x1527   : > { %v1429_v22 = vpop.permute.xlu0 %1428 }
0x1528   : > { %v1431_v23 = vadd.f32 %v1429_v22, %v1420_v21 }
0x152a   : > { %2055 = vtanh.f32 %v1431_v23 }
0x1534   : > { %v2056_v36 = vpop.eup %2055 }
0x1535   : > { %1435 = vrot.lane.b32.xlu1 %v2056_v36, %s2239_s11 }
0x15a7   : > { %v1436_v26 = vpop.permute.xlu1 %1435 }
0x15a8   : > { %v1438_v28 = vmul.f32 %v1436_v26, %v1433_v25 }
0x15aa   : > { %v1440_v29 = vadd.f32 %v1439_v27, %v1438_v28 }
0x15ac   : > { %1442 = vrot.lane.b32.xlu0 %v1440_v29, %s2239_s11  ;;  %s2649_s11 = scalar_lea.sflag [#allocation6], %s335_s12 }
0x161e   : > { %v1443_v44 = vpop.permute.xlu0 %1442 }
0x161f   : > { %1447 = vst.msk [vmem:[%s1446_s25] sm:$0xff] %vm354_vm0, %v1443_v44  ;;  %1448 = vst.msk [vmem:[#allocation2] sm:$0xff] %vm354_vm0, %v1443_v44 }
0x1620   : > { %2154 = shalt.err (!%p2151_p7)
}
0x1621   : > { %s2155_s12 = scalar_lea.hbm %s2643_s28, 1024  ;;  %s2159_s15 = scalar_lea.hbm %s2702_s6, 2048 }
0x1622   : > { %p2156_p9 = scmp.ne.s32.totalorder %s2643_s28, %s2155_s12  ;;  %p2160_p2 = scmp.lt.u32.totalorder %s2643_s28, %s2702_s6 }
0x1623   : > { %p2161_p1 = scmp.lt.u32.totalorder %s2159_s15, %s2155_s12  ;;  %p2163_p8 = scmp.lt.u32.totalorder %s2155_s12, %s2643_s28 }
0x1624   : > { %p2157_p12 = pnand %p2156_p9, %p2720_p10 }
0x1625   : > { %p2162_p13 = por %p2161_p1, %p2160_p2 }
0x1626   : > { %p2158_p4 = pneg %p2157_p12 }
0x1627   : > { %p2164_p11 = por %p2163_p8, %p2162_p13 }
0x1629   : > { %p2165_p0 = pnand %p2164_p11, %p2158_p4 }
0x162b   : > { %2168 = shalt.err (!%p2165_p0)
}
0x162c   : > { %s2241_s14 = smov 128   ;;  %s2242_s25 = smov 8  }
0x162d   : > { %1923 = dma.vmem_to_hbm [thread:$0]  (%p2720_p10), %s2635_s17, 1024, %s2643_s28, %s2649_s11, %s2241_s14, %s2241_s14, %s2242_s25  }
0x162e PF: > { %s1485_s29 = sand.u32 1, %s2207_s21   ;;  %p2721_p3 = scmp.ne.s32.totalorder %s2712_s9, 0 }
0x162f   : > { %p2722_p5 = scmp.ge.s32.totalorder %s2227_s26, 2  ;;  %s1486_s19 = scalar_lea.sflag [#allocation6], %s1485_s29 }
0x1631   : > { %p1937_p6 = pnand %p2722_p5, %p2721_p3 }
0x1633   : > { %2202 = dma.done.wait (!%p1937_p6), %s1486_s19, 1024  }
0x1634   : > { %2204 = vsyncadd (!%p1937_p6), %s1486_s19, 4294966272  ;;  %s23_s26 = sadd.s32 1, %s2227_s26   ;;  %s2723_s24 = sld [smem:[#allocation14_spill]] }
0x1635   : > { %p20_p7 = scmp.ge.s32.totalorder %s23_s26, 4   ;;  %s2724_s25 = sld [smem:[#allocation15_spill]] }
0x1636   : > { %s2725_s21 = smov %s2211_s22  ;;  %s2726_s22 = smov %s2215_s23 }
0x1637   : > { %s2727_s23 = smov %s2331_s10  ;;  %22 = sbr.rel (!%p20_p7) target bundleno = 7 (0x7), region = 122 }
0x163e   :  { %1491 = vsyncpa [#allocation5], 1 }
0x163f   :  { %1493 = vsyncpa [#allocation5 + $0x1], 1 }
0x1640   :  { %1494 = vsyncpa [#allocation8], 1 }
0x1641   :  { %1495 = vsyncpa [#allocation6], 1 }
0x1642   :  { %1497 = vsyncpa [#allocation6 + $0x1], 1 }

</bundles_post_ra>
